<compile_context>
chip_gen: v7x
topology: tpu7x:2x2x1
jax: 0.10.0
libtpu: 0.0.40
codegen_flags: <defaults>
</compile_context>

<pallas_src>
import functools

import jax
import jax.numpy as jnp
from jax.experimental import pallas as pl
from jax.experimental.pallas import tpu as pltpu

Z_SIZE = 100
Z_PAD = 128                      # z padded to a lane-aligned K for the fc matmul
BN_EPS = 1e-5
_VMEM_LIMIT = 48 * 1024 * 1024   # explicit budget; safe on v5e/v6e (128 MiB) and v7x (64 MiB)


# ----------------------------------------------------------------------------
# helpers
# ----------------------------------------------------------------------------
def _pick_tile(m, target):
    """Largest divisor of m that is <= target and a multiple of 8 (else m itself)."""
    if m <= target:
        return m
    for t in range(target, 7, -8):
        if m % t == 0:
            return t
    return m


# ----------------------------------------------------------------------------
# Pallas kernels
# ----------------------------------------------------------------------------
def _linear_kernel(x_ref, w_ref, b_ref, o_ref):
    x = x_ref[...].astype(jnp.bfloat16)
    o_ref[...] = jnp.dot(x, w_ref[...],
                         preferred_element_type=jnp.float32) + b_ref[...]


def _convmm_kernel(x_ref, w_ref, o_ref):
    # sub-pixel ConvTranspose matmul: (tm, Ci) @ (Ci, 16*Co), f32 accumulate
    x = x_ref[...].astype(jnp.bfloat16)
    o_ref[...] = jnp.dot(x, w_ref[...], preferred_element_type=jnp.float32)


def _make_convmm_bn_relu_kernel(count, eps):
    # previous layer's training-mode BatchNorm + ReLU fused into this matmul's input
    inv_count = 1.0 / float(count)

    def kernel(x_ref, stats_ref, gamma_ref, beta_ref, w_ref, o_ref):
        st = stats_ref[...]                                   # (2, Ci): [sum; sum_sq]
        mean = st[0:1, :] * inv_count
        var = jnp.maximum(st[1:2, :] * inv_count - mean * mean, 0.0)
        scale = gamma_ref[...] * jax.lax.rsqrt(var + eps)     # f32 BN math (v5e-safe)
        shift = beta_ref[...] - mean * scale
        xa = jnp.maximum(x_ref[...] * scale + shift, 0.0)     # BN + ReLU
        o_ref[...] = jnp.dot(xa.astype(jnp.bfloat16), w_ref[...],
                             preferred_element_type=jnp.float32)

    return kernel


def _stats_kernel(x_ref, o_ref):
    # per-channel sum / sum-of-squares accumulated over row tiles (resident output)
    @pl.when(pl.program_id(0) == 0)
    def _():
        o_ref[...] = jnp.zeros_like(o_ref)

    x = x_ref[...]
    o_ref[0:1, :] += jnp.sum(x, axis=0, keepdims=True)
    o_ref[1:2, :] += jnp.sum(x * x, axis=0, keepdims=True)


def _tanh_kernel(x_ref, o_ref):
    o_ref[...] = jnp.tanh(x_ref[...])


# ----------------------------------------------------------------------------
# Pallas wrappers (row-tiled, auto-pipelined)
# ----------------------------------------------------------------------------
def pallas_linear(x, w, b):
    m, k = x.shape
    n = w.shape[1]
    tm = _pick_tile(m, 256)
    return pl.pallas_call(
        _linear_kernel,
        grid=(m // tm,),
        out_shape=jax.ShapeDtypeStruct((m, n), jnp.float32),
        in_specs=[pl.BlockSpec((tm, k), lambda i: (i, 0)),
                  pl.BlockSpec((k, n), lambda i: (0, 0)),
                  pl.BlockSpec((1, n), lambda i: (0, 0))],
        out_specs=pl.BlockSpec((tm, n), lambda i: (i, 0)),
        compiler_params=pltpu.CompilerParams(
            dimension_semantics=("parallel",),
            vmem_limit_bytes=_VMEM_LIMIT),
    )(x, w, b)


def pallas_conv_mm(x, w_dec):
    m, k = x.shape
    n = w_dec.shape[1]
    tm = _pick_tile(m, 256)
    return pl.pallas_call(
        _convmm_kernel,
        grid=(m // tm,),
        out_shape=jax.ShapeDtypeStruct((m, n), jnp.float32),
        in_specs=[pl.BlockSpec((tm, k), lambda i: (i, 0)),
                  pl.BlockSpec((k, n), lambda i: (0, 0))],
        out_specs=pl.BlockSpec((tm, n), lambda i: (i, 0)),
        compiler_params=pltpu.CompilerParams(
            dimension_semantics=("parallel",),
            vmem_limit_bytes=_VMEM_LIMIT),
    )(x, w_dec)


def pallas_conv_mm_bn_relu(x, stats, gamma, beta, w_dec, count):
    m, k = x.shape
    n = w_dec.shape[1]
    tm = _pick_tile(m, 256)
    kernel = _make_convmm_bn_relu_kernel(count, BN_EPS)
    return pl.pallas_call(
        kernel,
        grid=(m // tm,),
        out_shape=jax.ShapeDtypeStruct((m, n), jnp.float32),
        in_specs=[pl.BlockSpec((tm, k), lambda i: (i, 0)),
                  pl.BlockSpec((2, k), lambda i: (0, 0)),
                  pl.BlockSpec((1, k), lambda i: (0, 0)),
                  pl.BlockSpec((1, k), lambda i: (0, 0)),
                  pl.BlockSpec((k, n), lambda i: (0, 0))],
        out_specs=pl.BlockSpec((tm, n), lambda i: (i, 0)),
        compiler_params=pltpu.CompilerParams(
            dimension_semantics=("parallel",),
            vmem_limit_bytes=_VMEM_LIMIT),
    )(x, stats, gamma, beta, w_dec)


def pallas_channel_stats(x):
    m, c = x.shape
    tm = _pick_tile(m, 512)
    return pl.pallas_call(
        _stats_kernel,
        grid=(m // tm,),
        out_shape=jax.ShapeDtypeStruct((2, c), jnp.float32),
        in_specs=[pl.BlockSpec((tm, c), lambda i: (i, 0))],
        out_specs=pl.BlockSpec((2, c), lambda i: (0, 0)),
        compiler_params=pltpu.CompilerParams(
            dimension_semantics=("arbitrary",)),
    )(x)


def pallas_tanh(x):
    m, c = x.shape
    tm = _pick_tile(m, 512)
    return pl.pallas_call(
        _tanh_kernel,
        grid=(m // tm,),
        out_shape=jax.ShapeDtypeStruct((m, c), jnp.float32),
        in_specs=[pl.BlockSpec((tm, c), lambda i: (i, 0))],
        out_specs=pl.BlockSpec((tm, c), lambda i: (i, 0)),
        compiler_params=pltpu.CompilerParams(
            dimension_semantics=("parallel",)),
    )(x)


# ----------------------------------------------------------------------------
# ConvTranspose2d(k=4, s=2, p=1) tap scatter:  out[2h+kh-1, 2w+kw-1] += Y[h, w, kh, kw]
# TODO(synk): the strided scatter-add + layout transposes stay as plain-XLA glue
# (overlapping stride-2 writes have no clean single-pass Pallas tiling here).
# ----------------------------------------------------------------------------
def _scatter_taps(y, batch, h, w, co):
    oh, ow = 2 * h, 2 * w
    y = y.reshape(batch, h, w, 4, 4, co)
    out = jnp.zeros((batch, oh + 2, ow + 2, co), y.dtype)   # 1-padded to absorb OOB taps
    for kh in range(4):
        for kw in range(4):
            out = out.at[:, kh:kh + oh:2, kw:kw + ow:2, :].add(y[:, :, :, kh, kw, :])
    return out[:, 1:oh + 1, 1:ow + 1, :]


# ----------------------------------------------------------------------------
# Generator parameters + forward
# ----------------------------------------------------------------------------
def init_generator_params(key, z_size, conv_dim):
    ks = jax.random.split(key, 8)
    cd = conv_dim
    fc_out = cd * 8 * 2 * 2
    chans = (cd * 8, cd * 4, cd * 2, cd, 3)

    # nn.Linear(z, fc_out): weight (out, in) -> stored transposed, K padded to 128, bf16
    fc_w = 0.05 * jax.random.normal(ks[0], (fc_out, z_size), jnp.float32)
    fc_w_t = jnp.zeros((Z_PAD, fc_out), jnp.float32).at[:z_size, :].set(fc_w.T)
    fc_b = 0.01 * jax.random.normal(ks[1], (fc_out,), jnp.float32)

    def dec(wt):
        # ConvTranspose2d weight (Ci, Co, 4, 4) -> (Ci, 16*Co), col order (kh, kw, co)
        ci, co = wt.shape[0], wt.shape[1]
        return jnp.transpose(wt, (0, 2, 3, 1)).reshape(ci, 16 * co).astype(jnp.bfloat16)

    p = {
        "conv_dim": cd,
        "fc_w_t": fc_w_t.astype(jnp.bfloat16),
        "fc_b": fc_b[None, :],
    }
    for i in range(1, 5):
        wt = 0.05 * jax.random.normal(ks[1 + i], (chans[i - 1], chans[i], 4, 4),
                                      jnp.float32)
        p[f"wdec{i}"] = dec(wt)
    for i, c in ((1, cd * 4), (2, cd * 2), (3, cd)):
        p[f"gamma{i}"] = jnp.ones((1, c), jnp.float32)   # BatchNorm weight
        p[f"beta{i}"] = jnp.zeros((1, c), jnp.float32)   # BatchNorm bias
    return p


def generator_forward(params, x):
    cd = params["conv_dim"]
    B = x.shape[0]
    chans = (cd * 8, cd * 4, cd * 2, cd, 3)

    # fc: pad z to 128 lanes (padded weight rows are zero -> identical result)
    xin = jnp.zeros((B, Z_PAD), jnp.float32).at[:, :x.shape[1]].set(
        x.astype(jnp.float32))
    out = pallas_linear(xin, params["fc_w_t"], params["fc_b"])      # (B, cd*32)

    # .view(-1, cd*8, 2, 2) (NCHW) -> NHWC rows for the conv path
    out = jnp.transpose(out.reshape(B, cd * 8, 2, 2), (0, 2, 3, 1))
    h = w = 2
    flat = out.reshape(B * h * w, chans[0])

    # t_conv1 (its input has no BN/ReLU)
    y = pallas_conv_mm(flat, params["wdec1"])
    o = _scatter_taps(y, B, h, w, chans[1])
    h, w = 2 * h, 2 * w

    # t_conv2..4: previous layer's BatchNorm+ReLU fused into this layer's matmul
    for i in (2, 3, 4):
        m = B * h * w
        flat = o.reshape(m, chans[i - 1])
        stats = pallas_channel_stats(flat)                # per-channel sum / sum_sq
        y = pallas_conv_mm_bn_relu(flat, stats,
                                   params[f"gamma{i - 1}"], params[f"beta{i - 1}"],
                                   params[f"wdec{i}"], count=m)
        o = _scatter_taps(y, B, h, w, chans[i])
        h, w = 2 * h, 2 * w

    # final tanh on a lane-dense (rows, 128) view; B*32*32*3 is a multiple of 128
    total = B * h * w * 3
    img = pallas_tanh(o.reshape(total // 128, 128)).reshape(B, h, w, 3)
    return jnp.transpose(img, (0, 3, 1, 2))               # NCHW (B, 3, 32, 32)


# ----------------------------------------------------------------------------
if __name__ == "__main__":
    key = jax.random.PRNGKey(0)
    pkey, xkey = jax.random.split(key)

    conv_dim = 8
    batch = 2

    params = init_generator_params(pkey, Z_SIZE, conv_dim)
    x = jax.random.normal(xkey, (batch, Z_SIZE), jnp.float32)   # latent z

    fwd = jax.jit(functools.partial(generator_forward, params))
    y = jax.block_until_ready(fwd(x))

    assert y.shape == (batch, 3, 32, 32), y.shape
    assert bool(jnp.all(jnp.isfinite(y)))
    assert bool(jnp.all(jnp.abs(y) <= 1.0 + 1e-6))      # tanh range
    print("KERNEL_OK")
</pallas_src>

<mosaic_0001>
module attributes {stable_mosaic.version = 11 : i64} {
  func.func @_linear_kernel(%arg0: i32, %arg1: memref<2x128xf32, #tpu.memory_space<vmem>>, %arg2: memref<128x256xbf16, #tpu.memory_space<vmem>>, %arg3: memref<1x256xf32, #tpu.memory_space<vmem>>, %arg4: memref<2x256xf32, #tpu.memory_space<vmem>>) attributes {dimension_semantics = [#tpu.dimension_semantics<parallel>], iteration_bounds = array<i64: 1>, scalar_prefetch = 0 : i64, scratch_operands = 0 : i64, tpu.core_type = #tpu.core_type<tc>, window_params = [{transform_indices = @transform_0, window_bounds = array<i64: 2, 128>}, {pipeline_mode = #tpu.pipeline_mode<synchronous>, transform_indices = @transform_1, window_bounds = array<i64: 128, 256>}, {pipeline_mode = #tpu.pipeline_mode<synchronous>, transform_indices = @transform_2, window_bounds = array<i64: 1, 256>}, {transform_indices = @transform_3, window_bounds = array<i64: 2, 256>}]} {
    %c0 = arith.constant 0 : index
    %c0_0 = arith.constant 0 : index
    %0 = vector.load %arg1[%c0, %c0_0] : memref<2x128xf32, #tpu.memory_space<vmem>>, vector<2x128xf32>
    %1 = arith.truncf %0 : vector<2x128xf32> to vector<2x128xbf16>
    %c0_1 = arith.constant 0 : index
    %c0_2 = arith.constant 0 : index
    %2 = vector.load %arg2[%c0_1, %c0_2] : memref<128x256xbf16, #tpu.memory_space<vmem>>, vector<128x256xbf16>
    %cst = arith.constant dense<0.000000e+00> : vector<2x256xf32>
    %3 = tpu.matmul %1, %2, %cst {dimension_numbers = #tpu.dot_dimension_numbers<[1], [0], [0], [1], [0, 0, 1, 1], [], []>} : vector<2x128xbf16>, vector<128x256xbf16>, vector<2x256xf32> -> vector<2x256xf32>
    %c0_3 = arith.constant 0 : index
    %c0_4 = arith.constant 0 : index
    %4 = vector.load %arg3[%c0_3, %c0_4] : memref<1x256xf32, #tpu.memory_space<vmem>>, vector<1x256xf32>
    %5 = vector.broadcast %4 : vector<1x256xf32> to vector<2x256xf32>
    %6 = arith.addf %3, %5 : vector<2x256xf32>
    %c0_5 = arith.constant 0 : index
    %c0_6 = arith.constant 0 : index
    %7 = vector.load %arg4[%c0_5, %c0_6] : memref<2x256xf32, #tpu.memory_space<vmem>>, vector<2x256xf32>
    tpu.vector_store %arg4[%c0_5, %c0_6], %6 {strides = array<i32>} : memref<2x256xf32, #tpu.memory_space<vmem>>, vector<2x256xf32>,
    return
  }
  func.func @transform_0(%arg0: i32) -> (i32, i32) {
    %c0_i32 = arith.constant 0 : i32
    %c0_i32_0 = arith.constant 0 : i32
    return %arg0, %c0_i32 : i32, i32
  }
  func.func @transform_1(%arg0: i32) -> (i32, i32) {
    %c0_i32 = arith.constant 0 : i32
    %c0_i32_0 = arith.constant 0 : i32
    %c0_i32_1 = arith.constant 0 : i32
    return %c0_i32, %c0_i32_0 : i32, i32
  }
  func.func @transform_2(%arg0: i32) -> (i32, i32) {
    %c0_i32 = arith.constant 0 : i32
    %c0_i32_0 = arith.constant 0 : i32
    %c0_i32_1 = arith.constant 0 : i32
    return %c0_i32, %c0_i32_0 : i32, i32
  }
  func.func @transform_3(%arg0: i32) -> (i32, i32) {
    %c0_i32 = arith.constant 0 : i32
    %c0_i32_0 = arith.constant 0 : i32
    return %arg0, %c0_i32 : i32, i32
  }
}

module attributes {stable_mosaic.version = 11 : i64} {
  func.func @_convmm_kernel(%arg0: i32, %arg1: memref<8x64xf32, #tpu.memory_space<vmem>>, %arg2: memref<64x512xbf16, #tpu.memory_space<vmem>>, %arg3: memref<8x512xf32, #tpu.memory_space<vmem>>) attributes {dimension_semantics = [#tpu.dimension_semantics<parallel>], iteration_bounds = array<i64: 1>, scalar_prefetch = 0 : i64, scratch_operands = 0 : i64, tpu.core_type = #tpu.core_type<tc>, window_params = [{transform_indices = @transform_0, window_bounds = array<i64: 8, 64>}, {pipeline_mode = #tpu.pipeline_mode<synchronous>, transform_indices = @transform_1, window_bounds = array<i64: 64, 512>}, {transform_indices = @transform_2, window_bounds = array<i64: 8, 512>}]} {
    %c0 = arith.constant 0 : index
    %c0_0 = arith.constant 0 : index
    %0 = vector.load %arg1[%c0, %c0_0] : memref<8x64xf32, #tpu.memory_space<vmem>>, vector<8x64xf32>
    %1 = arith.truncf %0 : vector<8x64xf32> to vector<8x64xbf16>
    %c0_1 = arith.constant 0 : index
    %c0_2 = arith.constant 0 : index
    %2 = vector.load %arg2[%c0_1, %c0_2] : memref<64x512xbf16, #tpu.memory_space<vmem>>, vector<64x512xbf16>
    %cst = arith.constant dense<0.000000e+00> : vector<8x512xf32>
    %3 = tpu.matmul %1, %2, %cst {dimension_numbers = #tpu.dot_dimension_numbers<[1], [0], [0], [1], [0, 0, 1, 1], [], []>} : vector<8x64xbf16>, vector<64x512xbf16>, vector<8x512xf32> -> vector<8x512xf32>
    %c0_3 = arith.constant 0 : index
    %c0_4 = arith.constant 0 : index
    %4 = vector.load %arg3[%c0_3, %c0_4] : memref<8x512xf32, #tpu.memory_space<vmem>>, vector<8x512xf32>
    tpu.vector_store %arg3[%c0_3, %c0_4], %3 {strides = array<i32>} : memref<8x512xf32, #tpu.memory_space<vmem>>, vector<8x512xf32>,
    return
  }
  func.func @transform_0(%arg0: i32) -> (i32, i32) {
    %c0_i32 = arith.constant 0 : i32
    %c0_i32_0 = arith.constant 0 : i32
    return %arg0, %c0_i32 : i32, i32
  }
  func.func @transform_1(%arg0: i32) -> (i32, i32) {
    %c0_i32 = arith.constant 0 : i32
    %c0_i32_0 = arith.constant 0 : i32
    %c0_i32_1 = arith.constant 0 : i32
    return %c0_i32, %c0_i32_0 : i32, i32
  }
  func.func @transform_2(%arg0: i32) -> (i32, i32) {
    %c0_i32 = arith.constant 0 : i32
    %c0_i32_0 = arith.constant 0 : i32
    return %arg0, %c0_i32 : i32, i32
  }
}

module attributes {stable_mosaic.version = 11 : i64} {
  func.func @_stats_kernel(%arg0: i32, %arg1: memref<32x32xf32, #tpu.memory_space<vmem>>, %arg2: memref<2x32xf32, #tpu.memory_space<vmem>>) attributes {dimension_semantics = [#tpu.dimension_semantics<arbitrary>], iteration_bounds = array<i64: 1>, scalar_prefetch = 0 : i64, scratch_operands = 0 : i64, tpu.core_type = #tpu.core_type<tc>, window_params = [{transform_indices = @transform_0, window_bounds = array<i64: 32, 32>}, {pipeline_mode = #tpu.pipeline_mode<synchronous>, transform_indices = @transform_1, window_bounds = array<i64: 2, 32>}]} {
    %c0_i32 = arith.constant 0 : i32
    %0 = arith.cmpi eq, %arg0, %c0_i32 : i32
    %1 = arith.extui %0 : i1 to i32
    %c0_i32_0 = arith.constant 0 : i32
    %2 = arith.cmpi ne, %1, %c0_i32_0 : i32
    scf.if %2 {
      %cst_10 = arith.constant 0.000000e+00 : f32
      %15 = vector.broadcast %cst_10 : f32 to vector<2x32xf32>
      %c0_11 = arith.constant 0 : index
      %c0_12 = arith.constant 0 : index
      %16 = vector.load %arg2[%c0_11, %c0_12] : memref<2x32xf32, #tpu.memory_space<vmem>>, vector<2x32xf32>
      tpu.vector_store %arg2[%c0_11, %c0_12], %15 {strides = array<i32>} : memref<2x32xf32, #tpu.memory_space<vmem>>, vector<2x32xf32>,
    } else {
    }
    %c0 = arith.constant 0 : index
    %c0_1 = arith.constant 0 : index
    %3 = vector.load %arg1[%c0, %c0_1] : memref<32x32xf32, #tpu.memory_space<vmem>>, vector<32x32xf32>
    %c0_2 = arith.constant 0 : index
    %c0_3 = arith.constant 0 : index
    %4 = vector.load %arg2[%c0_2, %c0_3] : memref<2x32xf32, #tpu.memory_space<vmem>>, vector<1x32xf32>
    %cst = arith.constant dense<0.000000e+00> : vector<32xf32>
    %5 = vector.multi_reduction <add>, %3, %cst [0] : vector<32x32xf32> to vector<32xf32>
    %6 = vector.shape_cast %5 : vector<32xf32> to vector<1x32xf32>
    %7 = arith.addf %4, %6 : vector<1x32xf32>
    %c0_4 = arith.constant 0 : index
    %c0_5 = arith.constant 0 : index
    %8 = vector.load %arg2[%c0_4, %c0_5] : memref<2x32xf32, #tpu.memory_space<vmem>>, vector<1x32xf32>
    tpu.vector_store %arg2[%c0_4, %c0_5], %7 {strides = array<i32>} : memref<2x32xf32, #tpu.memory_space<vmem>>, vector<1x32xf32>,
    %c1 = arith.constant 1 : index
    %c0_6 = arith.constant 0 : index
    %9 = vector.load %arg2[%c1, %c0_6] : memref<2x32xf32, #tpu.memory_space<vmem>>, vector<1x32xf32>
    %10 = arith.mulf %3, %3 : vector<32x32xf32>
    %cst_7 = arith.constant dense<0.000000e+00> : vector<32xf32>
    %11 = vector.multi_reduction <add>, %10, %cst_7 [0] : vector<32x32xf32> to vector<32xf32>
    %12 = vector.shape_cast %11 : vector<32xf32> to vector<1x32xf32>
    %13 = arith.addf %9, %12 : vector<1x32xf32>
    %c1_8 = arith.constant 1 : index
    %c0_9 = arith.constant 0 : index
    %14 = vector.load %arg2[%c1_8, %c0_9] : memref<2x32xf32, #tpu.memory_space<vmem>>, vector<1x32xf32>
    tpu.vector_store %arg2[%c1_8, %c0_9], %13 {strides = array<i32>} : memref<2x32xf32, #tpu.memory_space<vmem>>, vector<1x32xf32>,
    return
  }
  func.func @transform_0(%arg0: i32) -> (i32, i32) {
    %c0_i32 = arith.constant 0 : i32
    %c0_i32_0 = arith.constant 0 : i32
    return %arg0, %c0_i32 : i32, i32
  }
  func.func @transform_1(%arg0: i32) -> (i32, i32) {
    %c0_i32 = arith.constant 0 : i32
    %c0_i32_0 = arith.constant 0 : i32
    %c0_i32_1 = arith.constant 0 : i32
    return %c0_i32, %c0_i32_0 : i32, i32
  }
}

module attributes {stable_mosaic.version = 11 : i64} {
  func.func @kernel(%arg0: i32, %arg1: memref<32x32xf32, #tpu.memory_space<vmem>>, %arg2: memref<2x32xf32, #tpu.memory_space<vmem>>, %arg3: memref<1x32xf32, #tpu.memory_space<vmem>>, %arg4: memref<1x32xf32, #tpu.memory_space<vmem>>, %arg5: memref<32x256xbf16, #tpu.memory_space<vmem>>, %arg6: memref<32x256xf32, #tpu.memory_space<vmem>>) attributes {dimension_semantics = [#tpu.dimension_semantics<parallel>], iteration_bounds = array<i64: 1>, scalar_prefetch = 0 : i64, scratch_operands = 0 : i64, tpu.core_type = #tpu.core_type<tc>, window_params = [{transform_indices = @transform_0, window_bounds = array<i64: 32, 32>}, {pipeline_mode = #tpu.pipeline_mode<synchronous>, transform_indices = @transform_1, window_bounds = array<i64: 2, 32>}, {pipeline_mode = #tpu.pipeline_mode<synchronous>, transform_indices = @transform_2, window_bounds = array<i64: 1, 32>}, {pipeline_mode = #tpu.pipeline_mode<synchronous>, transform_indices = @transform_3, window_bounds = array<i64: 1, 32>}, {pipeline_mode = #tpu.pipeline_mode<synchronous>, transform_indices = @transform_4, window_bounds = array<i64: 32, 256>}, {transform_indices = @transform_5, window_bounds = array<i64: 32, 256>}]} {
    %c0 = arith.constant 0 : index
    %c0_0 = arith.constant 0 : index
    %0 = vector.load %arg2[%c0, %c0_0] : memref<2x32xf32, #tpu.memory_space<vmem>>, vector<2x32xf32>
    %1 = vector.extract_strided_slice %0 {offsets = [0, 0], sizes = [1, 32], strides = [1, 1]} : vector<2x32xf32> to vector<1x32xf32>
    %cst = arith.constant 3.125000e-02 : f32
    %2 = vector.broadcast %cst : f32 to vector<1x32xf32>
    %3 = arith.mulf %1, %2 : vector<1x32xf32>
    %4 = vector.extract_strided_slice %0 {offsets = [1, 0], sizes = [1, 32], strides = [1, 1]} : vector<2x32xf32> to vector<1x32xf32>
    %cst_1 = arith.constant 3.125000e-02 : f32
    %5 = vector.broadcast %cst_1 : f32 to vector<1x32xf32>
    %6 = arith.mulf %4, %5 : vector<1x32xf32>
    %7 = arith.mulf %3, %3 : vector<1x32xf32>
    %8 = arith.subf %6, %7 : vector<1x32xf32>
    %cst_2 = arith.constant 0.000000e+00 : f32
    %9 = vector.broadcast %cst_2 : f32 to vector<1x32xf32>
    %10 = arith.maximumf %8, %9 : vector<1x32xf32>
    %c0_3 = arith.constant 0 : index
    %c0_4 = arith.constant 0 : index
    %11 = vector.load %arg3[%c0_3, %c0_4] : memref<1x32xf32, #tpu.memory_space<vmem>>, vector<1x32xf32>
    %cst_5 = arith.constant 9.99999974E-6 : f32
    %12 = vector.broadcast %cst_5 : f32 to vector<1x32xf32>
    %13 = arith.addf %10, %12 : vector<1x32xf32>
    %14 = math.rsqrt %13 : vector<1x32xf32>
    %15 = arith.mulf %11, %14 : vector<1x32xf32>
    %c0_6 = arith.constant 0 : index
    %c0_7 = arith.constant 0 : index
    %16 = vector.load %arg4[%c0_6, %c0_7] : memref<1x32xf32, #tpu.memory_space<vmem>>, vector<1x32xf32>
    %17 = arith.mulf %3, %15 : vector<1x32xf32>
    %18 = arith.subf %16, %17 : vector<1x32xf32>
    %c0_8 = arith.constant 0 : index
    %c0_9 = arith.constant 0 : index
    %19 = vector.load %arg1[%c0_8, %c0_9] : memref<32x32xf32, #tpu.memory_space<vmem>>, vector<32x32xf32>
    %20 = vector.broadcast %15 : vector<1x32xf32> to vector<32x32xf32>
    %21 = arith.mulf %19, %20 : vector<32x32xf32>
    %22 = vector.broadcast %18 : vector<1x32xf32> to vector<32x32xf32>
    %23 = arith.addf %21, %22 : vector<32x32xf32>
    %cst_10 = arith.constant 0.000000e+00 : f32
    %24 = vector.broadcast %cst_10 : f32 to vector<32x32xf32>
    %25 = arith.maximumf %23, %24 : vector<32x32xf32>
    %26 = arith.truncf %25 : vector<32x32xf32> to vector<32x32xbf16>
    %c0_11 = arith.constant 0 : index
    %c0_12 = arith.constant 0 : index
    %27 = vector.load %arg5[%c0_11, %c0_12] : memref<32x256xbf16, #tpu.memory_space<vmem>>, vector<32x256xbf16>
    %cst_13 = arith.constant dense<0.000000e+00> : vector<32x256xf32>
    %28 = tpu.matmul %26, %27, %cst_13 {dimension_numbers = #tpu.dot_dimension_numbers<[1], [0], [0], [1], [0, 0, 1, 1], [], []>} : vector<32x32xbf16>, vector<32x256xbf16>, vector<32x256xf32> -> vector<32x256xf32>
    %c0_14 = arith.constant 0 : index
    %c0_15 = arith.constant 0 : index
    %29 = vector.load %arg6[%c0_14, %c0_15] : memref<32x256xf32, #tpu.memory_space<vmem>>, vector<32x256xf32>
    tpu.vector_store %arg6[%c0_14, %c0_15], %28 {strides = array<i32>} : memref<32x256xf32, #tpu.memory_space<vmem>>, vector<32x256xf32>,
    return
  }
  func.func @transform_0(%arg0: i32) -> (i32, i32) {
    %c0_i32 = arith.constant 0 : i32
    %c0_i32_0 = arith.constant 0 : i32
    return %arg0, %c0_i32 : i32, i32
  }
  func.func @transform_1(%arg0: i32) -> (i32, i32) {
    %c0_i32 = arith.constant 0 : i32
    %c0_i32_0 = arith.constant 0 : i32
    %c0_i32_1 = arith.constant 0 : i32
    return %c0_i32, %c0_i32_0 : i32, i32
  }
  func.func @transform_2(%arg0: i32) -> (i32, i32) {
    %c0_i32 = arith.constant 0 : i32
    %c0_i32_0 = arith.constant 0 : i32
    %c0_i32_1 = arith.constant 0 : i32
    return %c0_i32, %c0_i32_0 : i32, i32
  }
  func.func @transform_3(%arg0: i32) -> (i32, i32) {
    %c0_i32 = arith.constant 0 : i32
    %c0_i32_0 = arith.constant 0 : i32
    %c0_i32_1 = arith.constant 0 : i32
    return %c0_i32, %c0_i32_0 : i32, i32
  }
  func.func @transform_4(%arg0: i32) -> (i32, i32) {
    %c0_i32 = arith.constant 0 : i32
    %c0_i32_0 = arith.constant 0 : i32
    %c0_i32_1 = arith.constant 0 : i32
    return %c0_i32, %c0_i32_0 : i32, i32
  }
  func.func @transform_5(%arg0: i32) -> (i32, i32) {
    %c0_i32 = arith.constant 0 : i32
    %c0_i32_0 = arith.constant 0 : i32
    return %arg0, %c0_i32 : i32, i32
  }
}

module attributes {stable_mosaic.version = 11 : i64} {
  func.func @_stats_kernel(%arg0: i32, %arg1: memref<128x16xf32, #tpu.memory_space<vmem>>, %arg2: memref<2x16xf32, #tpu.memory_space<vmem>>) attributes {dimension_semantics = [#tpu.dimension_semantics<arbitrary>], iteration_bounds = array<i64: 1>, scalar_prefetch = 0 : i64, scratch_operands = 0 : i64, tpu.core_type = #tpu.core_type<tc>, window_params = [{transform_indices = @transform_0, window_bounds = array<i64: 128, 16>}, {pipeline_mode = #tpu.pipeline_mode<synchronous>, transform_indices = @transform_1, window_bounds = array<i64: 2, 16>}]} {
    %c0_i32 = arith.constant 0 : i32
    %0 = arith.cmpi eq, %arg0, %c0_i32 : i32
    %1 = arith.extui %0 : i1 to i32
    %c0_i32_0 = arith.constant 0 : i32
    %2 = arith.cmpi ne, %1, %c0_i32_0 : i32
    scf.if %2 {
      %cst_10 = arith.constant 0.000000e+00 : f32
      %15 = vector.broadcast %cst_10 : f32 to vector<2x16xf32>
      %c0_11 = arith.constant 0 : index
      %c0_12 = arith.constant 0 : index
      %16 = vector.load %arg2[%c0_11, %c0_12] : memref<2x16xf32, #tpu.memory_space<vmem>>, vector<2x16xf32>
      tpu.vector_store %arg2[%c0_11, %c0_12], %15 {strides = array<i32>} : memref<2x16xf32, #tpu.memory_space<vmem>>, vector<2x16xf32>,
    } else {
    }
    %c0 = arith.constant 0 : index
    %c0_1 = arith.constant 0 : index
    %3 = vector.load %arg1[%c0, %c0_1] : memref<128x16xf32, #tpu.memory_space<vmem>>, vector<128x16xf32>
    %c0_2 = arith.constant 0 : index
    %c0_3 = arith.constant 0 : index
    %4 = vector.load %arg2[%c0_2, %c0_3] : memref<2x16xf32, #tpu.memory_space<vmem>>, vector<1x16xf32>
    %cst = arith.constant dense<0.000000e+00> : vector<16xf32>
    %5 = vector.multi_reduction <add>, %3, %cst [0] : vector<128x16xf32> to vector<16xf32>
    %6 = vector.shape_cast %5 : vector<16xf32> to vector<1x16xf32>
    %7 = arith.addf %4, %6 : vector<1x16xf32>
    %c0_4 = arith.constant 0 : index
    %c0_5 = arith.constant 0 : index
    %8 = vector.load %arg2[%c0_4, %c0_5] : memref<2x16xf32, #tpu.memory_space<vmem>>, vector<1x16xf32>
    tpu.vector_store %arg2[%c0_4, %c0_5], %7 {strides = array<i32>} : memref<2x16xf32, #tpu.memory_space<vmem>>, vector<1x16xf32>,
    %c1 = arith.constant 1 : index
    %c0_6 = arith.constant 0 : index
    %9 = vector.load %arg2[%c1, %c0_6] : memref<2x16xf32, #tpu.memory_space<vmem>>, vector<1x16xf32>
    %10 = arith.mulf %3, %3 : vector<128x16xf32>
    %cst_7 = arith.constant dense<0.000000e+00> : vector<16xf32>
    %11 = vector.multi_reduction <add>, %10, %cst_7 [0] : vector<128x16xf32> to vector<16xf32>
    %12 = vector.shape_cast %11 : vector<16xf32> to vector<1x16xf32>
    %13 = arith.addf %9, %12 : vector<1x16xf32>
    %c1_8 = arith.constant 1 : index
    %c0_9 = arith.constant 0 : index
    %14 = vector.load %arg2[%c1_8, %c0_9] : memref<2x16xf32, #tpu.memory_space<vmem>>, vector<1x16xf32>
    tpu.vector_store %arg2[%c1_8, %c0_9], %13 {strides = array<i32>} : memref<2x16xf32, #tpu.memory_space<vmem>>, vector<1x16xf32>,
    return
  }
  func.func @transform_0(%arg0: i32) -> (i32, i32) {
    %c0_i32 = arith.constant 0 : i32
    %c0_i32_0 = arith.constant 0 : i32
    return %arg0, %c0_i32 : i32, i32
  }
  func.func @transform_1(%arg0: i32) -> (i32, i32) {
    %c0_i32 = arith.constant 0 : i32
    %c0_i32_0 = arith.constant 0 : i32
    %c0_i32_1 = arith.constant 0 : i32
    return %c0_i32, %c0_i32_0 : i32, i32
  }
}

module attributes {stable_mosaic.version = 11 : i64} {
  func.func @kernel(%arg0: i32, %arg1: memref<128x16xf32, #tpu.memory_space<vmem>>, %arg2: memref<2x16xf32, #tpu.memory_space<vmem>>, %arg3: memref<1x16xf32, #tpu.memory_space<vmem>>, %arg4: memref<1x16xf32, #tpu.memory_space<vmem>>, %arg5: memref<16x128xbf16, #tpu.memory_space<vmem>>, %arg6: memref<128x128xf32, #tpu.memory_space<vmem>>) attributes {dimension_semantics = [#tpu.dimension_semantics<parallel>], iteration_bounds = array<i64: 1>, scalar_prefetch = 0 : i64, scratch_operands = 0 : i64, tpu.core_type = #tpu.core_type<tc>, window_params = [{transform_indices = @transform_0, window_bounds = array<i64: 128, 16>}, {pipeline_mode = #tpu.pipeline_mode<synchronous>, transform_indices = @transform_1, window_bounds = array<i64: 2, 16>}, {pipeline_mode = #tpu.pipeline_mode<synchronous>, transform_indices = @transform_2, window_bounds = array<i64: 1, 16>}, {pipeline_mode = #tpu.pipeline_mode<synchronous>, transform_indices = @transform_3, window_bounds = array<i64: 1, 16>}, {pipeline_mode = #tpu.pipeline_mode<synchronous>, transform_indices = @transform_4, window_bounds = array<i64: 16, 128>}, {transform_indices = @transform_5, window_bounds = array<i64: 128, 128>}]} {
    %c0 = arith.constant 0 : index
    %c0_0 = arith.constant 0 : index
    %0 = vector.load %arg2[%c0, %c0_0] : memref<2x16xf32, #tpu.memory_space<vmem>>, vector<2x16xf32>
    %1 = vector.extract_strided_slice %0 {offsets = [0, 0], sizes = [1, 16], strides = [1, 1]} : vector<2x16xf32> to vector<1x16xf32>
    %cst = arith.constant 7.812500e-03 : f32
    %2 = vector.broadcast %cst : f32 to vector<1x16xf32>
    %3 = arith.mulf %1, %2 : vector<1x16xf32>
    %4 = vector.extract_strided_slice %0 {offsets = [1, 0], sizes = [1, 16], strides = [1, 1]} : vector<2x16xf32> to vector<1x16xf32>
    %cst_1 = arith.constant 7.812500e-03 : f32
    %5 = vector.broadcast %cst_1 : f32 to vector<1x16xf32>
    %6 = arith.mulf %4, %5 : vector<1x16xf32>
    %7 = arith.mulf %3, %3 : vector<1x16xf32>
    %8 = arith.subf %6, %7 : vector<1x16xf32>
    %cst_2 = arith.constant 0.000000e+00 : f32
    %9 = vector.broadcast %cst_2 : f32 to vector<1x16xf32>
    %10 = arith.maximumf %8, %9 : vector<1x16xf32>
    %c0_3 = arith.constant 0 : index
    %c0_4 = arith.constant 0 : index
    %11 = vector.load %arg3[%c0_3, %c0_4] : memref<1x16xf32, #tpu.memory_space<vmem>>, vector<1x16xf32>
    %cst_5 = arith.constant 9.99999974E-6 : f32
    %12 = vector.broadcast %cst_5 : f32 to vector<1x16xf32>
    %13 = arith.addf %10, %12 : vector<1x16xf32>
    %14 = math.rsqrt %13 : vector<1x16xf32>
    %15 = arith.mulf %11, %14 : vector<1x16xf32>
    %c0_6 = arith.constant 0 : index
    %c0_7 = arith.constant 0 : index
    %16 = vector.load %arg4[%c0_6, %c0_7] : memref<1x16xf32, #tpu.memory_space<vmem>>, vector<1x16xf32>
    %17 = arith.mulf %3, %15 : vector<1x16xf32>
    %18 = arith.subf %16, %17 : vector<1x16xf32>
    %c0_8 = arith.constant 0 : index
    %c0_9 = arith.constant 0 : index
    %19 = vector.load %arg1[%c0_8, %c0_9] : memref<128x16xf32, #tpu.memory_space<vmem>>, vector<128x16xf32>
    %20 = vector.broadcast %15 : vector<1x16xf32> to vector<128x16xf32>
    %21 = arith.mulf %19, %20 : vector<128x16xf32>
    %22 = vector.broadcast %18 : vector<1x16xf32> to vector<128x16xf32>
    %23 = arith.addf %21, %22 : vector<128x16xf32>
    %cst_10 = arith.constant 0.000000e+00 : f32
    %24 = vector.broadcast %cst_10 : f32 to vector<128x16xf32>
    %25 = arith.maximumf %23, %24 : vector<128x16xf32>
    %26 = arith.truncf %25 : vector<128x16xf32> to vector<128x16xbf16>
    %c0_11 = arith.constant 0 : index
    %c0_12 = arith.constant 0 : index
    %27 = vector.load %arg5[%c0_11, %c0_12] : memref<16x128xbf16, #tpu.memory_space<vmem>>, vector<16x128xbf16>
    %cst_13 = arith.constant dense<0.000000e+00> : vector<128x128xf32>
    %28 = tpu.matmul %26, %27, %cst_13 {dimension_numbers = #tpu.dot_dimension_numbers<[1], [0], [0], [1], [0, 0, 1, 1], [], []>} : vector<128x16xbf16>, vector<16x128xbf16>, vector<128x128xf32> -> vector<128x128xf32>
    %c0_14 = arith.constant 0 : index
    %c0_15 = arith.constant 0 : index
    %29 = vector.load %arg6[%c0_14, %c0_15] : memref<128x128xf32, #tpu.memory_space<vmem>>, vector<128x128xf32>
    tpu.vector_store %arg6[%c0_14, %c0_15], %28 {strides = array<i32>} : memref<128x128xf32, #tpu.memory_space<vmem>>, vector<128x128xf32>,
    return
  }
  func.func @transform_0(%arg0: i32) -> (i32, i32) {
    %c0_i32 = arith.constant 0 : i32
    %c0_i32_0 = arith.constant 0 : i32
    return %arg0, %c0_i32 : i32, i32
  }
  func.func @transform_1(%arg0: i32) -> (i32, i32) {
    %c0_i32 = arith.constant 0 : i32
    %c0_i32_0 = arith.constant 0 : i32
    %c0_i32_1 = arith.constant 0 : i32
    return %c0_i32, %c0_i32_0 : i32, i32
  }
  func.func @transform_2(%arg0: i32) -> (i32, i32) {
    %c0_i32 = arith.constant 0 : i32
    %c0_i32_0 = arith.constant 0 : i32
    %c0_i32_1 = arith.constant 0 : i32
    return %c0_i32, %c0_i32_0 : i32, i32
  }
  func.func @transform_3(%arg0: i32) -> (i32, i32) {
    %c0_i32 = arith.constant 0 : i32
    %c0_i32_0 = arith.constant 0 : i32
    %c0_i32_1 = arith.constant 0 : i32
    return %c0_i32, %c0_i32_0 : i32, i32
  }
  func.func @transform_4(%arg0: i32) -> (i32, i32) {
    %c0_i32 = arith.constant 0 : i32
    %c0_i32_0 = arith.constant 0 : i32
    %c0_i32_1 = arith.constant 0 : i32
    return %c0_i32, %c0_i32_0 : i32, i32
  }
  func.func @transform_5(%arg0: i32) -> (i32, i32) {
    %c0_i32 = arith.constant 0 : i32
    %c0_i32_0 = arith.constant 0 : i32
    return %arg0, %c0_i32 : i32, i32
  }
}

module attributes {stable_mosaic.version = 11 : i64} {
  func.func @_stats_kernel(%arg0: i32, %arg1: memref<512x8xf32, #tpu.memory_space<vmem>>, %arg2: memref<2x8xf32, #tpu.memory_space<vmem>>) attributes {dimension_semantics = [#tpu.dimension_semantics<arbitrary>], iteration_bounds = array<i64: 1>, scalar_prefetch = 0 : i64, scratch_operands = 0 : i64, tpu.core_type = #tpu.core_type<tc>, window_params = [{transform_indices = @transform_0, window_bounds = array<i64: 512, 8>}, {pipeline_mode = #tpu.pipeline_mode<synchronous>, transform_indices = @transform_1, window_bounds = array<i64: 2, 8>}]} {
    %c0_i32 = arith.constant 0 : i32
    %0 = arith.cmpi eq, %arg0, %c0_i32 : i32
    %1 = arith.extui %0 : i1 to i32
    %c0_i32_0 = arith.constant 0 : i32
    %2 = arith.cmpi ne, %1, %c0_i32_0 : i32
    scf.if %2 {
      %cst_10 = arith.constant 0.000000e+00 : f32
      %15 = vector.broadcast %cst_10 : f32 to vector<2x8xf32>
      %c0_11 = arith.constant 0 : index
      %c0_12 = arith.constant 0 : index
      %16 = vector.load %arg2[%c0_11, %c0_12] : memref<2x8xf32, #tpu.memory_space<vmem>>, vector<2x8xf32>
      tpu.vector_store %arg2[%c0_11, %c0_12], %15 {strides = array<i32>} : memref<2x8xf32, #tpu.memory_space<vmem>>, vector<2x8xf32>,
    } else {
    }
    %c0 = arith.constant 0 : index
    %c0_1 = arith.constant 0 : index
    %3 = vector.load %arg1[%c0, %c0_1] : memref<512x8xf32, #tpu.memory_space<vmem>>, vector<512x8xf32>
    %c0_2 = arith.constant 0 : index
    %c0_3 = arith.constant 0 : index
    %4 = vector.load %arg2[%c0_2, %c0_3] : memref<2x8xf32, #tpu.memory_space<vmem>>, vector<1x8xf32>
    %cst = arith.constant dense<0.000000e+00> : vector<8xf32>
    %5 = vector.multi_reduction <add>, %3, %cst [0] : vector<512x8xf32> to vector<8xf32>
    %6 = vector.shape_cast %5 : vector<8xf32> to vector<1x8xf32>
    %7 = arith.addf %4, %6 : vector<1x8xf32>
    %c0_4 = arith.constant 0 : index
    %c0_5 = arith.constant 0 : index
    %8 = vector.load %arg2[%c0_4, %c0_5] : memref<2x8xf32, #tpu.memory_space<vmem>>, vector<1x8xf32>
    tpu.vector_store %arg2[%c0_4, %c0_5], %7 {strides = array<i32>} : memref<2x8xf32, #tpu.memory_space<vmem>>, vector<1x8xf32>,
    %c1 = arith.constant 1 : index
    %c0_6 = arith.constant 0 : index
    %9 = vector.load %arg2[%c1, %c0_6] : memref<2x8xf32, #tpu.memory_space<vmem>>, vector<1x8xf32>
    %10 = arith.mulf %3, %3 : vector<512x8xf32>
    %cst_7 = arith.constant dense<0.000000e+00> : vector<8xf32>
    %11 = vector.multi_reduction <add>, %10, %cst_7 [0] : vector<512x8xf32> to vector<8xf32>
    %12 = vector.shape_cast %11 : vector<8xf32> to vector<1x8xf32>
    %13 = arith.addf %9, %12 : vector<1x8xf32>
    %c1_8 = arith.constant 1 : index
    %c0_9 = arith.constant 0 : index
    %14 = vector.load %arg2[%c1_8, %c0_9] : memref<2x8xf32, #tpu.memory_space<vmem>>, vector<1x8xf32>
    tpu.vector_store %arg2[%c1_8, %c0_9], %13 {strides = array<i32>} : memref<2x8xf32, #tpu.memory_space<vmem>>, vector<1x8xf32>,
    return
  }
  func.func @transform_0(%arg0: i32) -> (i32, i32) {
    %c0_i32 = arith.constant 0 : i32
    %c0_i32_0 = arith.constant 0 : i32
    return %arg0, %c0_i32 : i32, i32
  }
  func.func @transform_1(%arg0: i32) -> (i32, i32) {
    %c0_i32 = arith.constant 0 : i32
    %c0_i32_0 = arith.constant 0 : i32
    %c0_i32_1 = arith.constant 0 : i32
    return %c0_i32, %c0_i32_0 : i32, i32
  }
}

module attributes {stable_mosaic.version = 11 : i64} {
  func.func @kernel(%arg0: i32, %arg1: memref<256x8xf32, #tpu.memory_space<vmem>>, %arg2: memref<2x8xf32, #tpu.memory_space<vmem>>, %arg3: memref<1x8xf32, #tpu.memory_space<vmem>>, %arg4: memref<1x8xf32, #tpu.memory_space<vmem>>, %arg5: memref<8x48xbf16, #tpu.memory_space<vmem>>, %arg6: memref<256x48xf32, #tpu.memory_space<vmem>>) attributes {dimension_semantics = [#tpu.dimension_semantics<parallel>], iteration_bounds = array<i64: 2>, scalar_prefetch = 0 : i64, scratch_operands = 0 : i64, tpu.core_type = #tpu.core_type<tc>, window_params = [{transform_indices = @transform_0, window_bounds = array<i64: 256, 8>}, {pipeline_mode = #tpu.pipeline_mode<synchronous>, transform_indices = @transform_1, window_bounds = array<i64: 2, 8>}, {pipeline_mode = #tpu.pipeline_mode<synchronous>, transform_indices = @transform_2, window_bounds = array<i64: 1, 8>}, {pipeline_mode = #tpu.pipeline_mode<synchronous>, transform_indices = @transform_3, window_bounds = array<i64: 1, 8>}, {pipeline_mode = #tpu.pipeline_mode<synchronous>, transform_indices = @transform_4, window_bounds = array<i64: 8, 48>}, {transform_indices = @transform_5, window_bounds = array<i64: 256, 48>}]} {
    %c0 = arith.constant 0 : index
    %c0_0 = arith.constant 0 : index
    %0 = vector.load %arg2[%c0, %c0_0] : memref<2x8xf32, #tpu.memory_space<vmem>>, vector<2x8xf32>
    %1 = vector.extract_strided_slice %0 {offsets = [0, 0], sizes = [1, 8], strides = [1, 1]} : vector<2x8xf32> to vector<1x8xf32>
    %cst = arith.constant 0.001953125 : f32
    %2 = vector.broadcast %cst : f32 to vector<1x8xf32>
    %3 = arith.mulf %1, %2 : vector<1x8xf32>
    %4 = vector.extract_strided_slice %0 {offsets = [1, 0], sizes = [1, 8], strides = [1, 1]} : vector<2x8xf32> to vector<1x8xf32>
    %cst_1 = arith.constant 0.001953125 : f32
    %5 = vector.broadcast %cst_1 : f32 to vector<1x8xf32>
    %6 = arith.mulf %4, %5 : vector<1x8xf32>
    %7 = arith.mulf %3, %3 : vector<1x8xf32>
    %8 = arith.subf %6, %7 : vector<1x8xf32>
    %cst_2 = arith.constant 0.000000e+00 : f32
    %9 = vector.broadcast %cst_2 : f32 to vector<1x8xf32>
    %10 = arith.maximumf %8, %9 : vector<1x8xf32>
    %c0_3 = arith.constant 0 : index
    %c0_4 = arith.constant 0 : index
    %11 = vector.load %arg3[%c0_3, %c0_4] : memref<1x8xf32, #tpu.memory_space<vmem>>, vector<1x8xf32>
    %cst_5 = arith.constant 9.99999974E-6 : f32
    %12 = vector.broadcast %cst_5 : f32 to vector<1x8xf32>
    %13 = arith.addf %10, %12 : vector<1x8xf32>
    %14 = math.rsqrt %13 : vector<1x8xf32>
    %15 = arith.mulf %11, %14 : vector<1x8xf32>
    %c0_6 = arith.constant 0 : index
    %c0_7 = arith.constant 0 : index
    %16 = vector.load %arg4[%c0_6, %c0_7] : memref<1x8xf32, #tpu.memory_space<vmem>>, vector<1x8xf32>
    %17 = arith.mulf %3, %15 : vector<1x8xf32>
    %18 = arith.subf %16, %17 : vector<1x8xf32>
    %c0_8 = arith.constant 0 : index
    %c0_9 = arith.constant 0 : index
    %19 = vector.load %arg1[%c0_8, %c0_9] : memref<256x8xf32, #tpu.memory_space<vmem>>, vector<256x8xf32>
    %20 = vector.broadcast %15 : vector<1x8xf32> to vector<256x8xf32>
    %21 = arith.mulf %19, %20 : vector<256x8xf32>
    %22 = vector.broadcast %18 : vector<1x8xf32> to vector<256x8xf32>
    %23 = arith.addf %21, %22 : vector<256x8xf32>
    %cst_10 = arith.constant 0.000000e+00 : f32
    %24 = vector.broadcast %cst_10 : f32 to vector<256x8xf32>
    %25 = arith.maximumf %23, %24 : vector<256x8xf32>
    %26 = arith.truncf %25 : vector<256x8xf32> to vector<256x8xbf16>
    %c0_11 = arith.constant 0 : index
    %c0_12 = arith.constant 0 : index
    %27 = vector.load %arg5[%c0_11, %c0_12] : memref<8x48xbf16, #tpu.memory_space<vmem>>, vector<8x48xbf16>
    %cst_13 = arith.constant dense<0.000000e+00> : vector<256x48xf32>
    %28 = tpu.matmul %26, %27, %cst_13 {dimension_numbers = #tpu.dot_dimension_numbers<[1], [0], [0], [1], [0, 0, 1, 1], [], []>} : vector<256x8xbf16>, vector<8x48xbf16>, vector<256x48xf32> -> vector<256x48xf32>
    %c0_14 = arith.constant 0 : index
    %c0_15 = arith.constant 0 : index
    %29 = vector.load %arg6[%c0_14, %c0_15] : memref<256x48xf32, #tpu.memory_space<vmem>>, vector<256x48xf32>
    tpu.vector_store %arg6[%c0_14, %c0_15], %28 {strides = array<i32>} : memref<256x48xf32, #tpu.memory_space<vmem>>, vector<256x48xf32>,
    return
  }
  func.func @transform_0(%arg0: i32) -> (i32, i32) {
    %c0_i32 = arith.constant 0 : i32
    %c0_i32_0 = arith.constant 0 : i32
    return %arg0, %c0_i32 : i32, i32
  }
  func.func @transform_1(%arg0: i32) -> (i32, i32) {
    %c0_i32 = arith.constant 0 : i32
    %c0_i32_0 = arith.constant 0 : i32
    %c0_i32_1 = arith.constant 0 : i32
    return %c0_i32, %c0_i32_0 : i32, i32
  }
  func.func @transform_2(%arg0: i32) -> (i32, i32) {
    %c0_i32 = arith.constant 0 : i32
    %c0_i32_0 = arith.constant 0 : i32
    %c0_i32_1 = arith.constant 0 : i32
    return %c0_i32, %c0_i32_0 : i32, i32
  }
  func.func @transform_3(%arg0: i32) -> (i32, i32) {
    %c0_i32 = arith.constant 0 : i32
    %c0_i32_0 = arith.constant 0 : i32
    %c0_i32_1 = arith.constant 0 : i32
    return %c0_i32, %c0_i32_0 : i32, i32
  }
  func.func @transform_4(%arg0: i32) -> (i32, i32) {
    %c0_i32 = arith.constant 0 : i32
    %c0_i32_0 = arith.constant 0 : i32
    %c0_i32_1 = arith.constant 0 : i32
    return %c0_i32, %c0_i32_0 : i32, i32
  }
  func.func @transform_5(%arg0: i32) -> (i32, i32) {
    %c0_i32 = arith.constant 0 : i32
    %c0_i32_0 = arith.constant 0 : i32
    return %arg0, %c0_i32 : i32, i32
  }
}

module attributes {stable_mosaic.version = 11 : i64} {
  func.func @_tanh_kernel(%arg0: i32, %arg1: memref<48x128xf32, #tpu.memory_space<vmem>>, %arg2: memref<48x128xf32, #tpu.memory_space<vmem>>) attributes {dimension_semantics = [#tpu.dimension_semantics<parallel>], iteration_bounds = array<i64: 1>, scalar_prefetch = 0 : i64, scratch_operands = 0 : i64, tpu.core_type = #tpu.core_type<tc>, window_params = [{transform_indices = @transform_0, window_bounds = array<i64: 48, 128>}, {transform_indices = @transform_1, window_bounds = array<i64: 48, 128>}]} {
    %c0 = arith.constant 0 : index
    %c0_0 = arith.constant 0 : index
    %0 = vector.load %arg1[%c0, %c0_0] : memref<48x128xf32, #tpu.memory_space<vmem>>, vector<48x128xf32>
    %1 = math.tanh %0 : vector<48x128xf32>
    %c0_1 = arith.constant 0 : index
    %c0_2 = arith.constant 0 : index
    %2 = vector.load %arg2[%c0_1, %c0_2] : memref<48x128xf32, #tpu.memory_space<vmem>>, vector<48x128xf32>
    tpu.vector_store %arg2[%c0_1, %c0_2], %1 {strides = array<i32>} : memref<48x128xf32, #tpu.memory_space<vmem>>, vector<48x128xf32>,
    return
  }
  func.func @transform_0(%arg0: i32) -> (i32, i32) {
    %c0_i32 = arith.constant 0 : i32
    %c0_i32_0 = arith.constant 0 : i32
    return %arg0, %c0_i32 : i32, i32
  }
  func.func @transform_1(%arg0: i32) -> (i32, i32) {
    %c0_i32 = arith.constant 0 : i32
    %c0_i32_0 = arith.constant 0 : i32
    return %arg0, %c0_i32 : i32, i32
  }
}

</mosaic_0001>

<bundles_post_ra>
// kernel: generator_forward.10
= control target key start
LH: loop header
LB: loop body
LE: loop exit
PB: predicated region body
PF: predicated region fallthrough
CT: control target
= control target key end

     0   :  { %v247_v1 = vmov 0   ;;  %vm110_vm0 = vcmask 523264   ;;  %s326_s1 = inlined_call_operand.vmem [shape: bf16[64,512], index: 1, kind: input, shape index: {}]   ;;  %s327_s0 = inlined_call_operand.vmem [shape: f32[8,64], index: 0, kind: input, shape index: {}]   ;;  %s328_s2 = inlined_call_operand.vmem [shape: f32[8,512], index: 2, kind: output, shape index: {}]  }
   0x1   :  { %v223_v0 = vld [vmem:[%s326_s1 + $0x4] ss:$16 sps:$4 sm:$0xff]   ;;  %146 = vmatprep.mubr.bf16.mxu0 %v247_v1  ;;  %187 = vmatprep.mubr.bf16.mxu1 %v247_v1  ;;  %v225_v2 = vld [vmem:[%s326_s1 + $0xc] ss:$16 sps:$4 sm:$0xff]   ;;  %v227_v3 = vld [vmem:[%s326_s1] ss:$16 sps:$4 sm:$0xff]  }
   0x2   :  { %114 = vmatprep.subr.bf16.mxu0 %v223_v0  ;;  %v228_v4 = vld [vmem:[%s326_s1 + $0x8] ss:$16 sps:$4 sm:$0xff]   ;;  %155 = vmatprep.subr.bf16.mxu1 %v225_v2  ;;  %v229_v5 = vld [vmem:[%s326_s1 + $0x24] ss:$16 sps:$4 sm:$0xff]   ;;  %v231_v6 = vld [vmem:[%s326_s1 + $0x2c] ss:$16 sps:$4 sm:$0xff]  }
   0x3   :  { %115 = vmatpush1.bf16.msra.mxu0 %v227_v3  ;;  %156 = vmatpush1.bf16.msra.mxu1 %v228_v4  ;;  %v233_v7 = vld [vmem:[%s326_s1 + $0x20] ss:$16 sps:$4 sm:$0xff]   ;;  %v234_v8 = vld [vmem:[%s326_s1 + $0x28] ss:$16 sps:$4 sm:$0xff]   ;;  %v235_v9 = vld [vmem:[%s326_s1 + $0x44] ss:$16 sps:$4 sm:$0xff]  }
   0x4   :  { %116 = vmatprep.subr.bf16.mxu0 %v229_v5  ;;  %157 = vmatprep.subr.bf16.mxu1 %v231_v6  ;;  %v237_v10 = vld [vmem:[%s326_s1 + $0x4c] ss:$16 sps:$4 sm:$0xff]   ;;  %v239_v11 = vld [vmem:[%s326_s1 + $0x40] ss:$16 sps:$4 sm:$0xff]   ;;  %v240_v12 = vld [vmem:[%s326_s1 + $0x48] ss:$16 sps:$4 sm:$0xff]  }
   0x5   :  { %v241_v13 = vld [vmem:[%s326_s1 + $0x64] ss:$16 sps:$4 sm:$0xff]   ;;  %v243_v14 = vld [vmem:[%s326_s1 + $0x6c] ss:$16 sps:$4 sm:$0xff]   ;;  %v245_v15 = vld [vmem:[%s326_s1 + $0x60] ss:$16 sps:$4 sm:$0xff]  }
   0x6   :  { %v246_v16 = vld [vmem:[%s326_s1 + $0x68] ss:$16 sps:$4 sm:$0xff]   ;;  %v12_v17 = vld [vmem:[%s327_s0] sm:$0xff] }
   0x7   :  { %117 = vmatpush1.bf16.msra.mxu0 %v233_v7  ;;  %158 = vmatpush1.bf16.msra.mxu1 %v234_v8  ;;  %v13_v18 = vpack.c.bf16 %v12_v17, %v12_v17 }
   0x8   :  { %118 = vmatprep.subr.bf16.mxu0 %v235_v9  ;;  %159 = vmatprep.subr.bf16.mxu1 %v237_v10 }
   0xb   :  { %119 = vmatpush1.bf16.msra.mxu0 %v239_v11  ;;  %160 = vmatpush1.bf16.msra.mxu1 %v240_v12 }
   0xc   :  { %120 = vmatprep.subr.bf16.mxu0 %v241_v13  ;;  %161 = vmatprep.subr.bf16.mxu1 %v243_v14 }
   0xf   :  { %121 = vmatpush1.bf16.msra.mxu0 %v245_v15  ;;  %162 = vmatpush1.bf16.msra.mxu1 %v246_v16 }
  0x12   :  { %220 = vmatmul.mubr.msk.bf16.vlgmr.msra.gmra.mrb[0].mxu0 %vm110_vm0, %v13_v18  ;;  %221 = vmatmul.mubr.msk.bf16.vlgmr.msra.gmra.mrb[0].mxu1 %vm110_vm0, %v13_v18 }
  0xe5   :  { %v148_v19 = vpop.f32.mrb[0].mxu0  ;;  %v189_v20 = vpop.f32.mrb[0].mxu1 }
  0xe6   :  { %196 = vst [vmem:[%s328_s2] sm:$0xff] %v148_v19  ;;  %198 = vst [vmem:[%s328_s2 + $0x10] sm:$0xff] %v189_v20  ;;  %v150_v21 = vpop.f32.mrb[1].mxu0  ;;  %v191_v22 = vpop.f32.mrb[1].mxu1 }
  0xe7   :  { %197 = vst [vmem:[%s328_s2 + $0x8] sm:$0xff] %v150_v21  ;;  %199 = vst [vmem:[%s328_s2 + $0x18] sm:$0xff] %v191_v22  ;;  %v152_v23 = vpop.f32.mrb[2].mxu0  ;;  %v193_v24 = vpop.f32.mrb[2].mxu1 }
  0xe8   :  { %v153_v25 = vpop.f32.mrb[3].mxu0  ;;  %v194_v26 = vpop.f32.mrb[3].mxu1 }

// kernel: generator_forward.9
= control target key start
LH: loop header
LB: loop body
LE: loop exit
PB: predicated region body
PF: predicated region fallthrough
CT: control target
= control target key end

     0   :  { %8 = vsyncpa [#allocation3], 0  ;;  %s262_s12 = smov [#allocation2]   ;;  %s350_s0 = inlined_call_operand.vmem [shape: f32[2,128], index: 0, kind: input, shape index: {}]   ;;  %s351_s1 = inlined_call_operand.vmem [shape: bf16[128,256], index: 1, kind: input, shape index: {}]   ;;  %s352_s2 = inlined_call_operand.hbm [shape: f32[1,256], index: 2, kind: input, shape index: {}]   ;;  %s353_s3 = inlined_call_operand.vmem [shape: f32[2,256], index: 3, kind: output, shape index: {}]  }
   0x1   :  { %s19_s13 = sshll.u32 %s262_s12, 4  ;;  %s238_s16 = scalar_lea.hbm %s352_s2, 32  ;;  %s20_s13 = int_to_ptr.vmem [resolvable:$true] %s19_s13 }
   0x2   :  { %p239_p0 = scmp.ne.s32.totalorder %s352_s2, %s238_s16  ;;  %p242_p1 = scmp.lt.u32.totalorder %s238_s16, %s352_s2 }
   0x4   :  { %p244_p2 = pnand %p242_p1, %p239_p0 }
   0x6   :  { %247 = shalt.err (!%p244_p2)
}
   0x7   :  { %s248_s21 = scalar_lea.vmem %s20_s13, 32  ;;  %p253_p4 = scmp.lt.s32.totalorder %s20_s13, %s20_s13 }
   0x8   :  { %p249_p3 = scmp.ne.s32.totalorder %s20_s13, %s248_s21  ;;  %p254_p5 = scmp.lt.s32.totalorder %s248_s21, %s248_s21 }
   0xa   :  { %p255_p6 = por %p254_p5, %p253_p4 }
   0xc   :  { %p256_p7 = pnand %p255_p6, %p249_p3 }
   0xe   :  { %259 = shalt.err (!%p256_p7)
}
   0xf   :  { %22 = dma.hbm_to_vmem [thread:$0]  %s352_s2, 32, %s20_s13, [#allocation3]  }
  0x10   :  { %260 = dma.done.wait [#allocation3], 32  }
  0x11   :  { %261 = vsyncadd [#allocation3], 4294967264  ;;  %v263_v0 = vmov 0   ;;  %v214_v1 = vld [vmem:[%s351_s1 + $0x4] ss:$8 sps:$4 sm:$0xff]   ;;  %v47_v19 = vlaneseq }
  0x12   :  { %169 = vmatprep.mubr.bf16.mxu0 %v263_v0  ;;  %v216_v2 = vld [vmem:[%s351_s1] ss:$8 sps:$4 sm:$0xff]   ;;  %137 = vmatprep.subr.bf16.mxu0 %v214_v1  ;;  %v217_v3 = vld [vmem:[%s351_s1 + $0x14] ss:$8 sps:$4 sm:$0xff]   ;;  %v219_v4 = vld [vmem:[%s351_s1 + $0x10] ss:$8 sps:$4 sm:$0xff]  }
  0x13   :  { %138 = vmatpush1.bf16.msra.mxu0 %v216_v2  ;;  %v220_v5 = vld [vmem:[%s351_s1 + $0x24] ss:$8 sps:$4 sm:$0xff]   ;;  %v222_v6 = vld [vmem:[%s351_s1 + $0x20] ss:$8 sps:$4 sm:$0xff]   ;;  %v223_v7 = vld [vmem:[%s351_s1 + $0x34] ss:$8 sps:$4 sm:$0xff]  }
  0x14   :  { %139 = vmatprep.subr.bf16.mxu0 %v217_v3  ;;  %v225_v8 = vld [vmem:[%s351_s1 + $0x30] ss:$8 sps:$4 sm:$0xff]   ;;  %v226_v9 = vld [vmem:[%s351_s1 + $0x44] ss:$8 sps:$4 sm:$0xff]   ;;  %v228_v10 = vld [vmem:[%s351_s1 + $0x40] ss:$8 sps:$4 sm:$0xff]  }
  0x15   :  { %v229_v11 = vld [vmem:[%s351_s1 + $0x54] ss:$8 sps:$4 sm:$0xff]   ;;  %v231_v12 = vld [vmem:[%s351_s1 + $0x50] ss:$8 sps:$4 sm:$0xff]   ;;  %v232_v13 = vld [vmem:[%s351_s1 + $0x64] ss:$8 sps:$4 sm:$0xff]  }
  0x16   :  { %v234_v14 = vld [vmem:[%s351_s1 + $0x60] ss:$8 sps:$4 sm:$0xff]   ;;  %v235_v15 = vld [vmem:[%s351_s1 + $0x74] ss:$8 sps:$4 sm:$0xff]   ;;  %v237_v16 = vld [vmem:[%s351_s1 + $0x70] ss:$8 sps:$4 sm:$0xff]  }
  0x17   :  { %140 = vmatpush1.bf16.msra.mxu0 %v219_v4  ;;  %v27_v17 = vld [vmem:[%s350_s0] sm:$0x3]  ;;  %v48_v20 = vshrl.u32 %v47_v19, 7 }
  0x18   :  { %141 = vmatprep.subr.bf16.mxu0 %v220_v5  ;;  %v28_v18 = vpack.c.bf16 %v27_v17, %v27_v17  ;;  %v45_v22 = vld [vmem:[#allocation2] sm:$0x3] }
  0x19   :  { %v49_v21 = vsub.s32 0, %v48_v20  ;;  %v53_v23 = vsub.s32 1, %v48_v20 }
  0x1b   :  { %142 = vmatpush1.bf16.msra.mxu0 %v222_v6  ;;  %v50_v24 = vrot.slane %v45_v22, %v49_v21  ;;  %v54_v25 = vrot.slane %v45_v22, %v53_v23 }
  0x1c   :  { %143 = vmatprep.subr.bf16.mxu0 %v223_v7 }
  0x1f   :  { %144 = vmatpush1.bf16.msra.mxu0 %v225_v8 }
  0x20   :  { %145 = vmatprep.subr.bf16.mxu0 %v226_v9 }
  0x23   :  { %146 = vmatpush1.bf16.msra.mxu0 %v228_v10 }
  0x24   :  { %147 = vmatprep.subr.bf16.mxu0 %v229_v11 }
  0x27   :  { %148 = vmatpush1.bf16.msra.mxu0 %v231_v12 }
  0x28   :  { %149 = vmatprep.subr.bf16.mxu0 %v232_v13 }
  0x2b   :  { %150 = vmatpush1.bf16.msra.mxu0 %v234_v14 }
  0x2c   :  { %151 = vmatprep.subr.bf16.mxu0 %v235_v15 }
  0x2f   :  { %152 = vmatpush1.bf16.msra.mxu0 %v237_v16 }
  0x32   :  { %170 = vmatmul.mubr.bf16.vlgmr.msra.gmra.mrb[0].mxu0 %v28_v18 }
 0x105   :  { %v171_v26 = vpop.f32.mrb[0].mxu0 }
 0x106   :  { %v172_v27 = vadd.f32 %v171_v26, %v50_v24  ;;  %v173_v28 = vpop.f32.mrb[1].mxu0 }
 0x107   :  { %v174_v29 = vadd.f32 %v173_v28, %v54_v25  ;;  %v175_v30 = vpop.f32.mrb[2].mxu0 }
 0x108   :  { %v176_v31 = vpop.f32.mrb[3].mxu0 }
 0x109   :  { %v180_v32 = vcombine.low %v172_v27, %v174_v29 }
 0x10b   :  { %211 = vst.sshfl [vmem:[%s353_s3] sm:$0x33 pattern:$0x76325410] %v180_v32 }
 0x10c   :  { %194 = vsyncpa [#allocation3], 1 }

// kernel: generator_forward.11
= control target key start
LH: loop header
LB: loop body
LE: loop exit
PB: predicated region body
PF: predicated region fallthrough
CT: control target
= control target key end

     0   :  { %vm12_vm0 = vcmask 254976   ;;  %vm19_vm1 = vcmask 261120   ;;  %v61_v0 = vmov 0.0   ;;  %vm34_vm2 = vcmask 253952   ;;  %s107_s1 = inlined_call_operand.vmem [shape: f32[2,32], index: 1, kind: output, shape index: {}]   ;;  %s108_s0 = inlined_call_operand.vmem [shape: f32[32,32], index: 0, kind: input, shape index: {}]  }
   0x1   :  { %13 = vst.msk [vmem:[%s107_s1] sm:$0x3] %vm12_vm0, %v61_v0  ;;  %v14_v1 = vld [vmem:[%s108_s0] sm:$0xff]  ;;  %v15_v2 = vld [vmem:[%s108_s0 + $0x8] sm:$0xff]  ;;  %v16_v3 = vld [vmem:[%s108_s0 + $0x10] sm:$0xff] }
   0x2   :  { %v17_v4 = vld [vmem:[%s108_s0 + $0x18] sm:$0xff]  ;;  %v20_v5 = vsel %vm19_vm1, %v14_v1, 0.0  ;;  %v21_v6 = vsel %vm19_vm1, %v15_v2, 0.0  ;;  %v23_v7 = vsel %vm19_vm1, %v16_v3, 0.0  ;;  %v37_v8 = vmul.f32 %v14_v1, %v14_v1 }
   0x3   :  { %v22_v9 = vadd.f32 %v21_v6, %v20_v5  ;;  %v38_v10 = vmul.f32 %v15_v2, %v15_v2  ;;  %v39_v11 = vmul.f32 %v16_v3, %v16_v3  ;;  %v25_v12 = vsel %vm19_vm1, %v17_v4, 0.0 }
   0x4   :  { %v40_v13 = vmul.f32 %v17_v4, %v17_v4  ;;  %v41_v14 = vsel %vm19_vm1, %v37_v8, 0.0 }
   0x5   :  { %v24_v15 = vadd.f32 %v23_v7, %v22_v9  ;;  %v42_v16 = vsel %vm19_vm1, %v38_v10, 0.0  ;;  %v44_v17 = vsel %vm19_vm1, %v39_v11, 0.0 }
   0x6   :  { %v43_v18 = vadd.f32 %v42_v16, %v41_v14  ;;  %v46_v20 = vsel %vm19_vm1, %v40_v13, 0.0 }
   0x7   :  { %v26_v19 = vadd.f32 %v25_v12, %v24_v15 }
   0x8   :  { %v45_v21 = vadd.f32 %v44_v17, %v43_v18  ;;  %v18_v31 = vld [vmem:[%s107_s1] sm:$0x1]  ;;  %v36_v36 = vld [vmem:[%s107_s1 + $0x1] sm:$0x1] }
   0x9   :  { %v27_v22 = vrot.slane %v26_v19, 4 }
   0xa   :  { %v47_v23 = vadd.f32 %v46_v20, %v45_v21 }
   0xb   :  { %v28_v24 = vadd.f32 %v27_v22, %v26_v19 }
   0xc   :  { %v48_v25 = vrot.slane %v47_v23, 4 }
   0xd   :  { %v29_v26 = vrot.slane %v28_v24, 2 }
   0xe   :  { %v49_v27 = vadd.f32 %v48_v25, %v47_v23 }
   0xf   :  { %v30_v28 = vadd.f32 %v29_v26, %v28_v24 }
  0x10   :  { %v50_v29 = vrot.slane %v49_v27, 2 }
  0x11   :  { %v31_v30 = vrot.slane %v30_v28, 1 }
  0x12   :  { %v51_v32 = vadd.f32 %v50_v29, %v49_v27 }
  0x13   :  { %v32_v33 = vadd.f32 %v31_v30, %v30_v28 }
  0x14   :  { %v52_v34 = vrot.slane %v51_v32, 1 }
  0x15   :  { %v33_v35 = vadd.f32 %v32_v33, %v18_v31 }
  0x16   :  { %v53_v37 = vadd.f32 %v52_v34, %v51_v32 }
  0x17   :  { %35 = vst.msk [vmem:[%s107_s1] sm:$0x1] %vm34_vm2, %v33_v35 }
  0x18   :  { %v54_v38 = vadd.f32 %v53_v37, %v36_v36 }
  0x1a   :  { %55 = vst.msk [vmem:[%s107_s1 + $0x1] sm:$0x1] %vm34_vm2, %v54_v38 }

// kernel: generator_forward.12
= control target key start
LH: loop header
LB: loop body
LE: loop exit
PB: predicated region body
PF: predicated region fallthrough
CT: control target
= control target key end

     0   :  { %v199_v1 = vmov 0   ;;  %v200_v12 = vmov 1966171168   ;;  %v36_v14 = vlaneseq  ;;  %vm107_vm0 = vcmask 261120   ;;  %s288_s4 = inlined_call_operand.vmem [shape: bf16[32,256], index: 4, kind: input, shape index: {}]   ;;  %s289_s1 = inlined_call_operand.vmem [shape: f32[2,32], index: 1, kind: input, shape index: {}]   ;;  %s290_s2 = inlined_call_operand.vmem [shape: f32[1,32], index: 2, kind: input, shape index: {}]   ;;  %s291_s3 = inlined_call_operand.vmem [shape: f32[1,32], index: 3, kind: input, shape index: {}]   ;;  %s292_s0 = inlined_call_operand.vmem [shape: f32[32,32], index: 0, kind: input, shape index: {}]   ;;  %s293_s5 = inlined_call_operand.vmem [shape: f32[32,256], index: 5, kind: output, shape index: {}]  }
   0x1   :  { %v191_v0 = vld [vmem:[%s288_s4 + $0x4] ss:$8 sps:$4 sm:$0xff]   ;;  %146 = vmatprep.mubr.bf16.mxu0 %v199_v1  ;;  %156 = vmatprep.mubr.bf16.mxu1 %v199_v1  ;;  %v193_v2 = vld [vmem:[%s288_s4] ss:$8 sps:$4 sm:$0xff]   ;;  %v194_v3 = vld [vmem:[%s288_s4 + $0x14] ss:$8 sps:$4 sm:$0xff]   ;;  %v34_v13 = vunpack.c.l.s4 %v200_v12 }
   0x2   :  { %114 = vmatprep.subr.bf16.mxu0 %v191_v0  ;;  %185 = vmatprep.subr.bf16.mxu1 %v191_v0  ;;  %v21_v4 = vld [vmem:[%s289_s1] sm:$0x3]  ;;  %v196_v5 = vld [vmem:[%s288_s4 + $0x10] ss:$8 sps:$4 sm:$0xff]   ;;  %v37_v16 = vshrl.u32 %v36_v14, 7  ;;  %v54_v27 = vld [vmem:[%s292_s0 + $0x8] sm:$0xff] }
   0x3   :  { %115 = vmatpush1.bf16.msra.mxu0 %v193_v2  ;;  %187 = vmatpush1.bf16.msra.mxu1 %v193_v2  ;;  %v22_v6 = vmul.f32 0.03125, %v21_v4  ;;  %v35_v15 = vunpack.c.0.s8 %v34_v13  ;;  %v29_v21 = vld [vmem:[%s290_s2] sm:$0x1]  ;;  %v55_v28 = vld [vmem:[%s292_s0 + $0x10] sm:$0xff]  ;;  %v56_v31 = vld [vmem:[%s292_s0 + $0x18] sm:$0xff] }
   0x4   :  { %116 = vmatprep.subr.bf16.mxu0 %v194_v3  ;;  %186 = vmatprep.subr.bf16.mxu1 %v194_v3  ;;  %v60_v23 = vsub.s32 0, %v37_v16  ;;  %v50_v25 = vld [vmem:[%s291_s3] sm:$0x1] }
   0x5   :  { %v23_v7 = vmul.f32 %v22_v6, %v22_v6  ;;  %v38_v17 = vsub.s32 %v35_v15, %v37_v16  ;;  %v53_v26 = vld [vmem:[%s292_s0] sm:$0xff] }
   0x7   :  { %117 = vmatpush1.bf16.msra.mxu0 %v196_v5  ;;  %188 = vmatpush1.bf16.msra.mxu1 %v196_v5  ;;  %v25_v8 = vrot.slane %v23_v7, 7 }
   0x9   :  { %v27_v9 = vsub.f32 %v22_v6, %v25_v8 }
   0xb   :  { %v28_v10 = vmax.f32 %v27_v9, 0.0 }
   0xd   :  { %v30_v11 = vadd.f32 1e-05, %v28_v10 }
   0xf   :  { %197 = vrsqrt.f32 %v30_v11 }
  0x19   :  { %v198_v18 = vpop.eup %197 }
  0x1a   :  { %v39_v19 = vrot.slane %v198_v18, %v38_v17 }
  0x1c   :  { %v40_v20 = vcombine.high %v39_v19, %v39_v19 }
  0x1e   :  { %v47_v22 = vrot.slane %v40_v20, %v38_v17 }
  0x20   :  { %v49_v24 = vmul.f32 %v47_v22, %v29_v21 }
  0x22   :  { %v51_v29 = vmul.f32 %v49_v24, %v22_v6  ;;  %v61_v30 = vrot.slane %v49_v24, %v60_v23 }
  0x24   :  { %v52_v32 = vsub.f32 %v50_v25, %v51_v29  ;;  %v63_v33 = vmul.f32 %v61_v30, %v53_v26  ;;  %v64_v34 = vmul.f32 %v61_v30, %v54_v27  ;;  %v65_v35 = vmul.f32 %v61_v30, %v55_v28 }
  0x25   :  { %v66_v36 = vmul.f32 %v61_v30, %v56_v31 }
  0x26   :  { %v71_v37 = vrot.slane %v52_v32, %v60_v23 }
  0x28   :  { %v73_v38 = vadd.f32 %v71_v37, %v63_v33  ;;  %v74_v39 = vadd.f32 %v71_v37, %v64_v34  ;;  %v75_v40 = vadd.f32 %v71_v37, %v65_v35  ;;  %v76_v41 = vadd.f32 %v71_v37, %v66_v36 }
  0x2a   :  { %v77_v42 = vmax.f32 %v73_v38, 0.0  ;;  %v78_v43 = vmax.f32 %v74_v39, 0.0  ;;  %v79_v44 = vmax.f32 %v75_v40, 0.0  ;;  %v80_v45 = vmax.f32 %v76_v41, 0.0 }
  0x2c   :  { %v81_v46 = vpack.c.bf16 %v78_v43, %v77_v42  ;;  %v82_v47 = vpack.c.bf16 %v80_v45, %v79_v44 }
  0x2e   :  { %183 = vmatmul.mubr.msk.bf16.vlgmr.msra.gmra.mrb[0].mxu0 %vm107_vm0, %v81_v46  ;;  %184 = vmatmul.mubr.msk.bf16.vlgmr.msra.gmra.mrb[0].mxu1 %vm107_vm0, %v82_v47 }
 0x101   :  { %v148_v48 = vpop.f32.mrb[0].mxu0  ;;  %v158_v49 = vpop.f32.mrb[0].mxu1 }
 0x102   :  { %167 = vst [vmem:[%s293_s5] sm:$0xff] %v148_v48  ;;  %171 = vst [vmem:[%s293_s5 + $0x20] sm:$0xff] %v158_v49  ;;  %v150_v50 = vpop.f32.mrb[1].mxu0  ;;  %v160_v51 = vpop.f32.mrb[1].mxu1 }
 0x103   :  { %168 = vst [vmem:[%s293_s5 + $0x8] sm:$0xff] %v150_v50  ;;  %172 = vst [vmem:[%s293_s5 + $0x28] sm:$0xff] %v160_v51  ;;  %v152_v52 = vpop.f32.mrb[2].mxu0  ;;  %v162_v53 = vpop.f32.mrb[2].mxu1 }
 0x104   :  { %169 = vst [vmem:[%s293_s5 + $0x10] sm:$0xff] %v152_v52  ;;  %173 = vst [vmem:[%s293_s5 + $0x30] sm:$0xff] %v162_v53  ;;  %v154_v54 = vpop.f32.mrb[3].mxu0  ;;  %v164_v55 = vpop.f32.mrb[3].mxu1 }
 0x105   :  { %170 = vst [vmem:[%s293_s5 + $0x18] sm:$0xff] %v154_v54  ;;  %174 = vst [vmem:[%s293_s5 + $0x38] sm:$0xff] %v164_v55 }

// kernel: generator_forward.13
= control target key start
LH: loop header
LB: loop body
LE: loop exit
PB: predicated region body
PF: predicated region fallthrough
CT: control target
= control target key end

     0   :  { %vm12_vm0 = vcmask 123904   ;;  %vm31_vm1 = vcmask 130048   ;;  %v133_v0 = vmov 0.0   ;;  %vm70_vm2 = vcmask 122880   ;;  %s239_s1 = inlined_call_operand.vmem [shape: f32[2,16], index: 1, kind: output, shape index: {}]   ;;  %s240_s0 = inlined_call_operand.vmem [shape: f32[128,16], index: 0, kind: input, shape index: {}]  }
   0x1   :  { %13 = vst.msk [vmem:[%s239_s1] sm:$0x3] %vm12_vm0, %v133_v0  ;;  %v14_v1 = vld [vmem:[%s240_s0] sm:$0xff]  ;;  %v15_v2 = vld [vmem:[%s240_s0 + $0x8] sm:$0xff]  ;;  %v16_v3 = vld [vmem:[%s240_s0 + $0x10] sm:$0xff] }
   0x2   :  { %v32_v4 = vsel %vm31_vm1, %v14_v1, 0.0  ;;  %v33_v5 = vsel %vm31_vm1, %v15_v2, 0.0  ;;  %v35_v6 = vsel %vm31_vm1, %v16_v3, 0.0  ;;  %v17_v7 = vld [vmem:[%s240_s0 + $0x18] sm:$0xff]  ;;  %v18_v10 = vld [vmem:[%s240_s0 + $0x20] sm:$0xff]  ;;  %v19_v13 = vld [vmem:[%s240_s0 + $0x28] sm:$0xff]  ;;  %v73_v15 = vmul.f32 %v14_v1, %v14_v1 }
   0x3   :  { %v34_v8 = vadd.f32 %v33_v5, %v32_v4  ;;  %v37_v9 = vsel %vm31_vm1, %v17_v7, 0.0  ;;  %v39_v12 = vsel %vm31_vm1, %v18_v10, 0.0  ;;  %v74_v16 = vmul.f32 %v15_v2, %v15_v2  ;;  %v20_v19 = vld [vmem:[%s240_s0 + $0x30] sm:$0xff]  ;;  %v21_v24 = vld [vmem:[%s240_s0 + $0x38] sm:$0xff]  ;;  %v22_v31 = vld [vmem:[%s240_s0 + $0x40] sm:$0xff] }
   0x4   :  { %v75_v17 = vmul.f32 %v16_v3, %v16_v3  ;;  %v41_v18 = vsel %vm31_vm1, %v19_v13, 0.0  ;;  %v76_v21 = vmul.f32 %v17_v7, %v17_v7  ;;  %v43_v22 = vsel %vm31_vm1, %v20_v19, 0.0  ;;  %v23_v37 = vld [vmem:[%s240_s0 + $0x48] sm:$0xff]  ;;  %v24_v43 = vld [vmem:[%s240_s0 + $0x50] sm:$0xff]  ;;  %v25_v49 = vld [vmem:[%s240_s0 + $0x58] sm:$0xff] }
   0x5   :  { %v36_v11 = vadd.f32 %v35_v6, %v34_v8  ;;  %v77_v23 = vmul.f32 %v18_v10, %v18_v10  ;;  %v89_v26 = vsel %vm31_vm1, %v73_v15, 0.0  ;;  %v90_v27 = vsel %vm31_vm1, %v74_v16, 0.0  ;;  %v26_v55 = vld [vmem:[%s240_s0 + $0x60] sm:$0xff]  ;;  %v27_v61 = vld [vmem:[%s240_s0 + $0x68] sm:$0xff]  ;;  %v28_v3 = vld [vmem:[%s240_s0 + $0x70] sm:$0xff] }
   0x6   :  { %v92_v28 = vsel %vm31_vm1, %v75_v17, 0.0  ;;  %v45_v29 = vsel %vm31_vm1, %v21_v24, 0.0  ;;  %v91_v30 = vadd.f32 %v90_v27, %v89_v26  ;;  %v78_v33 = vmul.f32 %v19_v13, %v19_v13 }
   0x7   :  { %v38_v14 = vadd.f32 %v37_v9, %v36_v11  ;;  %v94_v34 = vsel %vm31_vm1, %v76_v21, 0.0  ;;  %v47_v35 = vsel %vm31_vm1, %v22_v31, 0.0  ;;  %v79_v39 = vmul.f32 %v20_v19, %v20_v19  ;;  %v29_v9 = vld [vmem:[%s240_s0 + $0x78] sm:$0xff] }
   0x8   :  { %v93_v36 = vadd.f32 %v92_v28, %v91_v30  ;;  %v96_v40 = vsel %vm31_vm1, %v77_v23, 0.0  ;;  %v49_v41 = vsel %vm31_vm1, %v23_v37, 0.0  ;;  %v80_v45 = vmul.f32 %v21_v24, %v21_v24 }
   0x9   :  { %v40_v20 = vadd.f32 %v39_v12, %v38_v14  ;;  %v98_v46 = vsel %vm31_vm1, %v78_v33, 0.0  ;;  %v51_v47 = vsel %vm31_vm1, %v24_v43, 0.0  ;;  %v81_v51 = vmul.f32 %v22_v31, %v22_v31 }
   0xa   :  { %v95_v42 = vadd.f32 %v94_v34, %v93_v36  ;;  %v100_v52 = vsel %vm31_vm1, %v79_v39, 0.0  ;;  %v53_v53 = vsel %vm31_vm1, %v25_v49, 0.0  ;;  %v82_v57 = vmul.f32 %v23_v37, %v23_v37  ;;  %v30_v36 = vld [vmem:[%s239_s1] sm:$0x1] }
   0xb   :  { %v42_v25 = vadd.f32 %v41_v18, %v40_v20  ;;  %v102_v58 = vsel %vm31_vm1, %v80_v45, 0.0  ;;  %v55_v59 = vsel %vm31_vm1, %v26_v55, 0.0  ;;  %v83_v63 = vmul.f32 %v24_v43, %v24_v43 }
   0xc   :  { %v97_v48 = vadd.f32 %v96_v40, %v95_v42  ;;  %v104_v0 = vsel %vm31_vm1, %v81_v51, 0.0  ;;  %v57_v1 = vsel %vm31_vm1, %v27_v61, 0.0  ;;  %v84_v5 = vmul.f32 %v25_v49, %v25_v49 }
   0xd   :  { %v44_v32 = vadd.f32 %v43_v22, %v42_v25  ;;  %v106_v6 = vsel %vm31_vm1, %v82_v57, 0.0  ;;  %v59_v7 = vsel %vm31_vm1, %v28_v3, 0.0  ;;  %v85_v11 = vmul.f32 %v26_v55, %v26_v55 }
   0xe   :  { %v99_v54 = vadd.f32 %v98_v46, %v97_v48  ;;  %v108_v12 = vsel %vm31_vm1, %v83_v63, 0.0  ;;  %v61_v13 = vsel %vm31_vm1, %v29_v9, 0.0  ;;  %v86_v16 = vmul.f32 %v27_v61, %v27_v61 }
   0xf   :  { %v46_v38 = vadd.f32 %v45_v29, %v44_v32  ;;  %v110_v17 = vsel %vm31_vm1, %v84_v5, 0.0  ;;  %v87_v20 = vmul.f32 %v28_v3, %v28_v3  ;;  %v112_v21 = vsel %vm31_vm1, %v85_v11, 0.0 }
  0x10   :  { %v101_v60 = vadd.f32 %v100_v52, %v99_v54  ;;  %v88_v24 = vmul.f32 %v29_v9, %v29_v9  ;;  %v114_v25 = vsel %vm31_vm1, %v86_v16, 0.0 }
  0x11   :  { %v48_v44 = vadd.f32 %v47_v35, %v46_v38  ;;  %v116_v28 = vsel %vm31_vm1, %v87_v20, 0.0 }
  0x12   :  { %v103_v2 = vadd.f32 %v102_v58, %v101_v60  ;;  %v118_v31 = vsel %vm31_vm1, %v88_v24, 0.0 }
  0x13   :  { %v50_v50 = vadd.f32 %v49_v41, %v48_v44  ;;  %v72_v44 = vld [vmem:[%s239_s1 + $0x1] sm:$0x1] }
  0x14   :  { %v105_v8 = vadd.f32 %v104_v0, %v103_v2 }
  0x15   :  { %v52_v56 = vadd.f32 %v51_v47, %v50_v50 }
  0x16   :  { %v107_v14 = vadd.f32 %v106_v6, %v105_v8 }
  0x17   :  { %v54_v62 = vadd.f32 %v53_v53, %v52_v56 }
  0x18   :  { %v109_v18 = vadd.f32 %v108_v12, %v107_v14 }
  0x19   :  { %v56_v4 = vadd.f32 %v55_v59, %v54_v62 }
  0x1a   :  { %v111_v22 = vadd.f32 %v110_v17, %v109_v18 }
  0x1b   :  { %v58_v10 = vadd.f32 %v57_v1, %v56_v4 }
  0x1c   :  { %v113_v26 = vadd.f32 %v112_v21, %v111_v22 }
  0x1d   :  { %v60_v15 = vadd.f32 %v59_v7, %v58_v10 }
  0x1e   :  { %v115_v29 = vadd.f32 %v114_v25, %v113_v26 }
  0x1f   :  { %v62_v19 = vadd.f32 %v61_v13, %v60_v15 }
  0x20   :  { %v117_v32 = vadd.f32 %v116_v28, %v115_v29 }
  0x21   :  { %v63_v23 = vrot.slane %v62_v19, 4 }
  0x22   :  { %v119_v34 = vadd.f32 %v118_v31, %v117_v32 }
  0x23   :  { %v64_v27 = vadd.f32 %v63_v23, %v62_v19 }
  0x24   :  { %v120_v37 = vrot.slane %v119_v34, 4 }
  0x25   :  { %v65_v30 = vrot.slane %v64_v27, 2 }
  0x26   :  { %v121_v39 = vadd.f32 %v120_v37, %v119_v34 }
  0x27   :  { %v66_v33 = vadd.f32 %v65_v30, %v64_v27 }
  0x28   :  { %v122_v41 = vrot.slane %v121_v39, 2 }
  0x29   :  { %v67_v35 = vrot.slane %v66_v33, 1 }
  0x2a   :  { %v123_v42 = vadd.f32 %v122_v41, %v121_v39 }
  0x2b   :  { %v68_v38 = vadd.f32 %v67_v35, %v66_v33 }
  0x2c   :  { %v124_v43 = vrot.slane %v123_v42, 1 }
  0x2d   :  { %v69_v40 = vadd.f32 %v68_v38, %v30_v36 }
  0x2e   :  { %v125_v45 = vadd.f32 %v124_v43, %v123_v42 }
  0x2f   :  { %71 = vst.msk [vmem:[%s239_s1] sm:$0x1] %vm70_vm2, %v69_v40 }
  0x30   :  { %v126_v46 = vadd.f32 %v125_v45, %v72_v44 }
  0x32   :  { %127 = vst.msk [vmem:[%s239_s1 + $0x1] sm:$0x1] %vm70_vm2, %v126_v46 }

// kernel: generator_forward.14
= control target key start
LH: loop header
LB: loop body
LE: loop exit
PB: predicated region body
PF: predicated region fallthrough
CT: control target
= control target key end

     0   :  { %v329_v8 = vmov 1966171168   ;;  %v36_v10 = vlaneseq  ;;  %vm145_vm0 = vcmask 130048   ;;  %s494_s4 = inlined_call_operand.vmem [shape: bf16[16,128], index: 4, kind: input, shape index: {}]   ;;  %s495_s1 = inlined_call_operand.vmem [shape: f32[2,16], index: 1, kind: input, shape index: {}]   ;;  %s496_s2 = inlined_call_operand.vmem [shape: f32[1,16], index: 2, kind: input, shape index: {}]   ;;  %s497_s0 = inlined_call_operand.vmem [shape: f32[128,16], index: 0, kind: input, shape index: {}]   ;;  %s498_s3 = inlined_call_operand.vmem [shape: f32[1,16], index: 3, kind: input, shape index: {}]   ;;  %s499_s5 = inlined_call_operand.vmem [shape: f32[128,128], index: 5, kind: output, shape index: {}]  }
   0x1   :  { %v326_v0 = vld [vmem:[%s494_s4] sm:$0xff]   ;;  %v34_v9 = vunpack.c.l.s4 %v329_v8  ;;  %v54_v23 = vld [vmem:[%s497_s0 + $0x8] sm:$0xff]  ;;  %v55_v26 = vld [vmem:[%s497_s0 + $0x10] sm:$0xff] }
   0x2   :  { %v21_v1 = vld [vmem:[%s495_s1] sm:$0x3]  ;;  %305 = vmatprep.subr.bf16.mxu0 %v326_v0  ;;  %323 = vmatprep.subr.bf16.mxu1 %v326_v0  ;;  %v37_v12 = vshrl.u32 %v36_v10, 7  ;;  %v62_v25 = vld [vmem:[%s497_s0 + $0x48] sm:$0xff]  ;;  %v56_v29 = vld [vmem:[%s497_s0 + $0x18] sm:$0xff] }
   0x3   :  { %v22_v2 = vmul.f32 0.0078125, %v21_v1  ;;  %306 = vmatpush3.bf16.msra.mxu0 %v326_v0  ;;  %324 = vmatpush3.bf16.msra.mxu1 %v326_v0  ;;  %v35_v11 = vunpack.c.0.s8 %v34_v9  ;;  %v29_v17 = vld [vmem:[%s496_s2] sm:$0x1]  ;;  %v63_v30 = vld [vmem:[%s497_s0 + $0x50] sm:$0xff]  ;;  %v64_v31 = vld [vmem:[%s497_s0 + $0x58] sm:$0xff] }
   0x4   :  { %v72_v19 = vsub.s32 0, %v37_v12  ;;  %v50_v21 = vld [vmem:[%s498_s3] sm:$0x1]  ;;  %v58_v33 = vld [vmem:[%s497_s0 + $0x28] sm:$0xff]  ;;  %v59_v40 = vld [vmem:[%s497_s0 + $0x30] sm:$0xff] }
   0x5   :  { %v23_v3 = vmul.f32 %v22_v2, %v22_v2  ;;  %v38_v13 = vsub.s32 %v35_v11, %v37_v12  ;;  %v53_v22 = vld [vmem:[%s497_s0] sm:$0xff]  ;;  %v66_v39 = vld [vmem:[%s497_s0 + $0x68] sm:$0xff]  ;;  %v60_v41 = vld [vmem:[%s497_s0 + $0x38] sm:$0xff] }
   0x6   :  { %v61_v24 = vld [vmem:[%s497_s0 + $0x40] sm:$0xff]  ;;  %v67_v10 = vld [vmem:[%s497_s0 + $0x70] sm:$0xff]  ;;  %v68_v11 = vld [vmem:[%s497_s0 + $0x78] sm:$0xff] }
   0x7   :  { %v25_v4 = vrot.slane %v23_v3, 7  ;;  %v57_v32 = vld [vmem:[%s497_s0 + $0x20] sm:$0xff] }
   0x8   :  { %v65_v34 = vld [vmem:[%s497_s0 + $0x60] sm:$0xff] }
   0x9   :  { %v27_v5 = vsub.f32 %v22_v2, %v25_v4 }
   0xb   :  { %v28_v6 = vmax.f32 %v27_v5, 0.0 }
   0xd   :  { %v30_v7 = vadd.f32 1e-05, %v28_v6 }
   0xf   :  { %327 = vrsqrt.f32 %v30_v7 }
  0x19   :  { %v328_v14 = vpop.eup %327 }
  0x1a   :  { %v39_v15 = vrot.slane %v328_v14, %v38_v13 }
  0x1c   :  { %v40_v16 = vcombine.high %v39_v15, %v39_v15 }
  0x1e   :  { %v47_v18 = vrot.slane %v40_v16, %v38_v13 }
  0x20   :  { %v49_v20 = vmul.f32 %v47_v18, %v29_v17 }
  0x22   :  { %v51_v27 = vmul.f32 %v49_v20, %v22_v2  ;;  %v387_v28 = vrot.slane %v49_v20, %v72_v19 }
  0x24   :  { %v52_v35 = vsub.f32 %v50_v21, %v51_v27  ;;  %v75_v36 = vmul.f32 %v387_v28, %v53_v22  ;;  %v76_v37 = vmul.f32 %v387_v28, %v54_v23  ;;  %v83_v38 = vmul.f32 %v387_v28, %v61_v24 }
  0x25   :  { %v84_v42 = vmul.f32 %v387_v28, %v62_v25  ;;  %v77_v43 = vmul.f32 %v387_v28, %v55_v26  ;;  %v78_v44 = vmul.f32 %v387_v28, %v56_v29  ;;  %v85_v45 = vmul.f32 %v387_v28, %v63_v30 }
  0x26   :  { %v95_v46 = vrot.slane %v52_v35, %v72_v19  ;;  %v86_v47 = vmul.f32 %v387_v28, %v64_v31  ;;  %v79_v48 = vmul.f32 %v387_v28, %v57_v32  ;;  %v80_v49 = vmul.f32 %v387_v28, %v58_v33 }
  0x27   :  { %v87_v50 = vmul.f32 %v387_v28, %v65_v34  ;;  %v88_v51 = vmul.f32 %v387_v28, %v66_v39  ;;  %v81_v52 = vmul.f32 %v387_v28, %v59_v40  ;;  %v82_v53 = vmul.f32 %v387_v28, %v60_v41 }
  0x28   :  { %v97_v54 = vadd.f32 %v95_v46, %v75_v36  ;;  %v98_v55 = vadd.f32 %v95_v46, %v76_v37  ;;  %v105_v56 = vadd.f32 %v95_v46, %v83_v38  ;;  %v106_v57 = vadd.f32 %v95_v46, %v84_v42 }
  0x29   :  { %v99_v58 = vadd.f32 %v95_v46, %v77_v43  ;;  %v100_v59 = vadd.f32 %v95_v46, %v78_v44  ;;  %v107_v60 = vadd.f32 %v95_v46, %v85_v45  ;;  %v108_v61 = vadd.f32 %v95_v46, %v86_v47 }
  0x2a   :  { %v113_v62 = vmax.f32 %v97_v54, 0.0  ;;  %v114_v63 = vmax.f32 %v98_v55, 0.0  ;;  %v121_v0 = vmax.f32 %v105_v56, 0.0  ;;  %v122_v1 = vmax.f32 %v106_v57, 0.0 }
  0x2b   :  { %v115_v2 = vmax.f32 %v99_v58, 0.0  ;;  %v116_v3 = vmax.f32 %v100_v59, 0.0  ;;  %v123_v4 = vmax.f32 %v107_v60, 0.0  ;;  %v124_v5 = vmax.f32 %v108_v61, 0.0 }
  0x2c   :  { %v129_v6 = vpack.c.bf16 %v114_v63, %v113_v62  ;;  %v133_v7 = vpack.c.bf16 %v122_v1, %v121_v0  ;;  %v101_v8 = vadd.f32 %v95_v46, %v79_v48  ;;  %v102_v9 = vadd.f32 %v95_v46, %v80_v49 }
  0x2d   :  { %v130_v12 = vpack.c.bf16 %v116_v3, %v115_v2  ;;  %v134_v13 = vpack.c.bf16 %v124_v5, %v123_v4  ;;  %v109_v14 = vadd.f32 %v95_v46, %v87_v50  ;;  %v110_v15 = vadd.f32 %v95_v46, %v88_v51 }
  0x2e   :  { %307 = vmatprep.mubr.msk.bf16.mxu0 %vm145_vm0, %v129_v6  ;;  %315 = vmatprep.mubr.msk.bf16.mxu1 %vm145_vm0, %v133_v7  ;;  %v117_v16 = vmax.f32 %v101_v8, 0.0  ;;  %v118_v17 = vmax.f32 %v102_v9, 0.0  ;;  %v103_v18 = vadd.f32 %v95_v46, %v81_v52  ;;  %v104_v19 = vadd.f32 %v95_v46, %v82_v53 }
  0x2f   :  { %308 = vmatmul.mubr.msk.bf16.vlgmr.msra.gmra.mrb[0].mxu0 %vm145_vm0, %v130_v12  ;;  %316 = vmatmul.mubr.msk.bf16.vlgmr.msra.gmra.mrb[0].mxu1 %vm145_vm0, %v134_v13  ;;  %v125_v20 = vmax.f32 %v109_v14, 0.0  ;;  %v126_v21 = vmax.f32 %v110_v15, 0.0  ;;  %v89_v22 = vmul.f32 %v387_v28, %v67_v10  ;;  %v90_v23 = vmul.f32 %v387_v28, %v68_v11 }
  0x30   :  { %v131_v24 = vpack.c.bf16 %v118_v17, %v117_v16  ;;  %v119_v25 = vmax.f32 %v103_v18, 0.0  ;;  %v120_v26 = vmax.f32 %v104_v19, 0.0 }
  0x31   :  { %v135_v27 = vpack.c.bf16 %v126_v21, %v125_v20  ;;  %v111_v29 = vadd.f32 %v95_v46, %v89_v22  ;;  %v112_v30 = vadd.f32 %v95_v46, %v90_v23 }
  0x32   :  { %311 = vmatprep.mubr.msk.bf16.mxu0 %vm145_vm0, %v131_v24  ;;  %v132_v31 = vpack.c.bf16 %v120_v26, %v119_v25 }
  0x33   :  { %319 = vmatprep.mubr.msk.bf16.mxu1 %vm145_vm0, %v135_v27  ;;  %v127_v32 = vmax.f32 %v111_v29, 0.0  ;;  %v128_v33 = vmax.f32 %v112_v30, 0.0 }
  0x35   :  { %v136_v34 = vpack.c.bf16 %v128_v33, %v127_v32 }
  0x37   :  { %312 = vmatmul.mubr.msk.bf16.gmra.mrb[4].mxu0 %vm145_vm0, %v132_v31  ;;  %320 = vmatmul.mubr.msk.bf16.gmra.mrb[4].mxu1 %vm145_vm0, %v136_v34 }
 0x102   :  { %v309_v35 = vpop.f32.mrb[0].mxu0  ;;  %v317_v28 = vpop.f32.mrb[0].mxu1 }
 0x103   :  { %269 = vst [vmem:[%s499_s5 + $0x10] sm:$0xff] %v309_v35  ;;  %277 = vst [vmem:[%s499_s5 + $0x50] sm:$0xff] %v317_v28  ;;  %v204_v36 = vpop.f32.mrb[1].mxu0  ;;  %v236_v37 = vpop.f32.mrb[1].mxu1 }
 0x104   :  { %267 = vst [vmem:[%s499_s5] sm:$0xff] %v204_v36  ;;  %275 = vst [vmem:[%s499_s5 + $0x40] sm:$0xff] %v236_v37  ;;  %v310_v38 = vpop.f32.mrb[2].mxu0  ;;  %v318_v39 = vpop.f32.mrb[2].mxu1 }
 0x105   :  { %270 = vst [vmem:[%s499_s5 + $0x18] sm:$0xff] %v310_v38  ;;  %278 = vst [vmem:[%s499_s5 + $0x58] sm:$0xff] %v318_v39  ;;  %v207_v40 = vpop.f32.mrb[3].mxu0  ;;  %v239_v41 = vpop.f32.mrb[3].mxu1 }
 0x106   :  { %268 = vst [vmem:[%s499_s5 + $0x8] sm:$0xff] %v207_v40  ;;  %276 = vst [vmem:[%s499_s5 + $0x48] sm:$0xff] %v239_v41 }
 0x10a   :  { %v313_v42 = vpop.f32.mrb[4].mxu0  ;;  %v321_v43 = vpop.f32.mrb[4].mxu1 }
 0x10b   :  { %273 = vst [vmem:[%s499_s5 + $0x30] sm:$0xff] %v313_v42  ;;  %281 = vst [vmem:[%s499_s5 + $0x70] sm:$0xff] %v321_v43  ;;  %v220_v44 = vpop.f32.mrb[5].mxu0  ;;  %v252_v45 = vpop.f32.mrb[5].mxu1 }
 0x10c   :  { %271 = vst [vmem:[%s499_s5 + $0x20] sm:$0xff] %v220_v44  ;;  %279 = vst [vmem:[%s499_s5 + $0x60] sm:$0xff] %v252_v45  ;;  %v314_v46 = vpop.f32.mrb[6].mxu0  ;;  %v322_v47 = vpop.f32.mrb[6].mxu1 }
 0x10d   :  { %274 = vst [vmem:[%s499_s5 + $0x38] sm:$0xff] %v314_v46  ;;  %282 = vst [vmem:[%s499_s5 + $0x78] sm:$0xff] %v322_v47  ;;  %v223_v48 = vpop.f32.mrb[7].mxu0  ;;  %v255_v49 = vpop.f32.mrb[7].mxu1 }
 0x10e   :  { %272 = vst [vmem:[%s499_s5 + $0x28] sm:$0xff] %v223_v48  ;;  %280 = vst [vmem:[%s499_s5 + $0x68] sm:$0xff] %v255_v49 }

// kernel: generator_forward.15
= control target key start
LH: loop header
LB: loop body
LE: loop exit
PB: predicated region body
PF: predicated region fallthrough
CT: control target
= control target key end

     0   :  { %vm12_vm0 = vcmask 58368   ;;  %vm79_vm1 = vcmask 64512   ;;  %v421_v0 = vmov 0.0   ;;  %vm214_vm2 = vcmask 57344   ;;  %s1301_s0 = inlined_call_operand.vmem [shape: f32[512,8], index: 0, kind: input, shape index: {}]   ;;  %s1302_s1 = inlined_call_operand.vmem [shape: f32[2,8], index: 1, kind: output, shape index: {}]  }
   0x1   :  { %13 = vst.msk [vmem:[%s1302_s1] sm:$0x3] %vm12_vm0, %v421_v0  ;;  %v438_v1 = vld [vmem:[%s1301_s0] sm:$0xff]  ;;  %v443_v2 = vld [vmem:[%s1301_s0 + $0x8] sm:$0xff]  ;;  %v448_v3 = vld [vmem:[%s1301_s0 + $0x10] sm:$0xff] }
   0x2   :  { %v80_v4 = vsel %vm79_vm1, %v438_v1, 0.0  ;;  %v81_v5 = vsel %vm79_vm1, %v443_v2, 0.0  ;;  %v83_v6 = vsel %vm79_vm1, %v448_v3, 0.0  ;;  %v459_v7 = vld [vmem:[%s1301_s0 + $0x18] sm:$0xff]  ;;  %v466_v10 = vld [vmem:[%s1301_s0 + $0x20] sm:$0xff]  ;;  %v473_v13 = vld [vmem:[%s1301_s0 + $0x28] sm:$0xff] }
   0x3   :  { %v82_v8 = vadd.f32 %v81_v5, %v80_v4  ;;  %v85_v9 = vsel %vm79_vm1, %v459_v7, 0.0  ;;  %v87_v12 = vsel %vm79_vm1, %v466_v10, 0.0  ;;  %v89_v15 = vsel %vm79_vm1, %v473_v13, 0.0  ;;  %v480_v16 = vld [vmem:[%s1301_s0 + $0x30] sm:$0xff]  ;;  %v485_v18 = vld [vmem:[%s1301_s0 + $0x38] sm:$0xff]  ;;  %v490_v19 = vld [vmem:[%s1301_s0 + $0x40] sm:$0xff] }
   0x4   :  { %v91_v20 = vsel %vm79_vm1, %v480_v16, 0.0  ;;  %v497_v21 = vld [vmem:[%s1301_s0 + $0x48] sm:$0xff]  ;;  %v502_v22 = vld [vmem:[%s1301_s0 + $0x50] sm:$0xff]  ;;  %v507_v23 = vld [vmem:[%s1301_s0 + $0x58] sm:$0xff]  ;;  %v93_v25 = vsel %vm79_vm1, %v485_v18, 0.0  ;;  %v95_v26 = vsel %vm79_vm1, %v490_v19, 0.0 }
   0x5   :  { %v84_v11 = vadd.f32 %v83_v6, %v82_v8  ;;  %v516_v27 = vld [vmem:[%s1301_s0 + $0x108] sm:$0xff]  ;;  %v521_v28 = vld [vmem:[%s1301_s0 + $0x110] sm:$0xff]  ;;  %v526_v29 = vld [vmem:[%s1301_s0 + $0x118] sm:$0xff]  ;;  %v97_v30 = vsel %vm79_vm1, %v497_v21, 0.0  ;;  %v99_v31 = vsel %vm79_vm1, %v502_v22, 0.0  ;;  %v534_v32 = vsel %vm79_vm1, %v507_v23, 0.0 }
   0x6   :  { %v539_v33 = vld [vmem:[%s1301_s0 + $0x120] sm:$0xff]  ;;  %v544_v34 = vld [vmem:[%s1301_s0 + $0x128] sm:$0xff]  ;;  %v549_v35 = vld [vmem:[%s1301_s0 + $0x130] sm:$0xff]  ;;  %v553_v37 = vsel %vm79_vm1, %v516_v27, 0.0  ;;  %v557_v38 = vsel %vm79_vm1, %v521_v28, 0.0  ;;  %v561_v39 = vsel %vm79_vm1, %v526_v29, 0.0 }
   0x7   :  { %v86_v14 = vadd.f32 %v85_v9, %v84_v11  ;;  %1321 = vst [vmem:[#allocation2_spill] sm:$0xff] %v553_v37  ;;  %1322 = vst [vmem:[#allocation3_spill] sm:$0xff] %v557_v38  ;;  %v566_v40 = vld [vmem:[%s1301_s0 + $0x138] sm:$0xff]  ;;  %v571_v41 = vld [vmem:[%s1301_s0 + $0x140] sm:$0xff]  ;;  %v580_v43 = vsel %vm79_vm1, %v539_v33, 0.0  ;;  %v584_v44 = vsel %vm79_vm1, %v544_v34, 0.0 }
   0x8   :  { %1323 = vst [vmem:[#allocation4_spill] sm:$0xff] %v561_v39  ;;  %v576_v42 = vld [vmem:[%s1301_s0 + $0x148] sm:$0xff]  ;;  %1324 = vst [vmem:[#allocation5_spill] sm:$0xff] %v580_v43  ;;  %v588_v45 = vsel %vm79_vm1, %v549_v35, 0.0  ;;  %v593_v46 = vld [vmem:[%s1301_s0 + $0x150] sm:$0xff]  ;;  %v607_v50 = vsel %vm79_vm1, %v566_v40, 0.0 }
   0x9   :  { %v88_v17 = vadd.f32 %v87_v12, %v86_v14  ;;  %1325 = vst [vmem:[#allocation6_spill] sm:$0xff] %v584_v44  ;;  %1326 = vst [vmem:[#allocation7_spill] sm:$0xff] %v588_v45  ;;  %v598_v47 = vld [vmem:[%s1301_s0 + $0x158] sm:$0xff]  ;;  %v603_v48 = vld [vmem:[%s1301_s0 + $0x160] sm:$0xff]  ;;  %v611_v51 = vsel %vm79_vm1, %v571_v41, 0.0  ;;  %v615_v52 = vsel %vm79_vm1, %v576_v42, 0.0  ;;  %v219_v45 = vmul.f32 %v448_v3, %v448_v3 }
   0xa   :  { %1327 = vst [vmem:[#allocation8_spill] sm:$0xff] %v607_v50  ;;  %1328 = vst [vmem:[#allocation9_spill] sm:$0xff] %v611_v51  ;;  %v620_v53 = vld [vmem:[%s1301_s0 + $0x168] sm:$0xff]  ;;  %v625_v54 = vld [vmem:[%s1301_s0 + $0x170] sm:$0xff]  ;;  %v634_v56 = vsel %vm79_vm1, %v593_v46, 0.0  ;;  %v638_v57 = vsel %vm79_vm1, %v598_v47, 0.0 }
   0xb   :  { %v90_v24 = vadd.f32 %v89_v15, %v88_v17  ;;  %1329 = vst [vmem:[#allocation10_spill] sm:$0xff] %v615_v52  ;;  %v630_v55 = vld [vmem:[%s1301_s0 + $0x178] sm:$0xff]  ;;  %1330 = vst [vmem:[#allocation11_spill] sm:$0xff] %v634_v56  ;;  %v642_v58 = vsel %vm79_vm1, %v603_v48, 0.0  ;;  %v647_v59 = vld [vmem:[%s1301_s0 + $0x180] sm:$0xff]  ;;  %v661_v63 = vsel %vm79_vm1, %v620_v53, 0.0 }
   0xc   :  { %1331 = vst [vmem:[#allocation12_spill] sm:$0xff] %v638_v57  ;;  %1332 = vst [vmem:[#allocation13_spill] sm:$0xff] %v642_v58  ;;  %v652_v60 = vld [vmem:[%s1301_s0 + $0x188] sm:$0xff]  ;;  %v657_v61 = vld [vmem:[%s1301_s0 + $0x190] sm:$0xff]  ;;  %v665_v0 = vsel %vm79_vm1, %v625_v54, 0.0  ;;  %v669_v4 = vsel %vm79_vm1, %v630_v55, 0.0 }
   0xd   :  { %v92_v36 = vadd.f32 %v91_v20, %v90_v24  ;;  %1333 = vst [vmem:[#allocation14_spill] sm:$0xff] %v661_v63  ;;  %1334 = vst [vmem:[#allocation15_spill] sm:$0xff] %v665_v0  ;;  %v674_v5 = vld [vmem:[%s1301_s0 + $0x198] sm:$0xff]  ;;  %v679_v6 = vld [vmem:[%s1301_s0 + $0x1a0] sm:$0xff]  ;;  %v688_v9 = vsel %vm79_vm1, %v647_v59, 0.0  ;;  %v692_v11 = vsel %vm79_vm1, %v652_v60, 0.0 }
   0xe   :  { %1335 = vst [vmem:[#allocation16_spill] sm:$0xff] %v669_v4  ;;  %v684_v8 = vld [vmem:[%s1301_s0 + $0x1a8] sm:$0xff]  ;;  %1336 = vst [vmem:[#allocation17_spill] sm:$0xff] %v688_v9  ;;  %v696_v12 = vsel %vm79_vm1, %v657_v61, 0.0  ;;  %v701_v14 = vld [vmem:[%s1301_s0 + $0x60] sm:$0xff] }
   0xf   :  { %v94_v49 = vadd.f32 %v93_v25, %v92_v36  ;;  %1337 = vst [vmem:[#allocation18_spill] sm:$0xff] %v692_v11  ;;  %1338 = vst [vmem:[#allocation19_spill] sm:$0xff] %v696_v12  ;;  %v706_v15 = vld [vmem:[%s1301_s0 + $0x1b0] sm:$0xff]  ;;  %v711_v17 = vld [vmem:[%s1301_s0 + $0x1b8] sm:$0xff]  ;;  %v720_v25 = vsel %vm79_vm1, %v674_v5, 0.0  ;;  %v728_v36 = vsel %vm79_vm1, %v684_v8, 0.0 }
  0x10   :  { %v716_v20 = vld [vmem:[%s1301_s0 + $0x1c0] sm:$0xff]  ;;  %1339 = vst [vmem:[#allocation20_spill] sm:$0xff] %v720_v25  ;;  %1341 = vst [vmem:[#allocation22_spill] sm:$0xff] %v728_v36  ;;  %v751_v36 = vsel %vm79_vm1, %v711_v17, 0.0  ;;  %v765_v11 = vld [vmem:[%s1301_s0 + $0x1e8] sm:$0xff] }
  0x11   :  { %v96_v62 = vadd.f32 %v95_v26, %v94_v49  ;;  %v724_v26 = vsel %vm79_vm1, %v679_v6, 0.0  ;;  %v733_v49 = vld [vmem:[%s1301_s0 + $0x1c8] sm:$0xff]  ;;  %1343 = vst [vmem:[#allocation24_spill] sm:$0xff] %v751_v36  ;;  %v755_v25 = vsel %vm79_vm1, %v716_v20, 0.0  ;;  %v760_v12 = vld [vmem:[%s1301_s0 + $0x1e0] sm:$0xff]  ;;  %v787_v0 = vld [vmem:[%s1301_s0 + $0x1f8] sm:$0xff] }
  0x12   :  { %1340 = vst [vmem:[#allocation21_spill] sm:$0xff] %v724_v26  ;;  %v747_v26 = vsel %vm79_vm1, %v706_v15, 0.0  ;;  %1344 = vst [vmem:[#allocation25_spill] sm:$0xff] %v755_v25  ;;  %v774_v9 = vsel %vm79_vm1, %v733_v49, 0.0  ;;  %v809_v58 = vsel %vm79_vm1, %v787_v0, 0.0  ;;  %v841_v56 = vld [vmem:[%s1301_s0 + $0x98] sm:$0xff] }
  0x13   :  { %v98_v24 = vadd.f32 %v97_v30, %v96_v62  ;;  %v738_v30 = vld [vmem:[%s1301_s0 + $0x1d0] sm:$0xff]  ;;  %v743_v62 = vld [vmem:[%s1301_s0 + $0x1d8] sm:$0xff]  ;;  %1342 = vst [vmem:[#allocation23_spill] sm:$0xff] %v747_v26  ;;  %1346 = vst [vmem:[#allocation27_spill] sm:$0xff] %v774_v9  ;;  %v797_v9 = vsel %vm79_vm1, %v765_v11, 0.0  ;;  %v117_v3 = vsel %vm79_vm1, %v841_v56, 0.0 }
  0x14   :  { %v770_v26 = vld [vmem:[%s1301_s0 + $0x1f0] sm:$0xff]  ;;  %v778_v25 = vsel %vm79_vm1, %v738_v30, 0.0  ;;  %v782_v4 = vsel %vm79_vm1, %v743_v62, 0.0  ;;  %1349 = vst [vmem:[#allocation30_spill] sm:$0xff] %v787_v0  ;;  %1351 = vst [vmem:[#allocation32_spill] sm:$0xff] %v797_v9  ;;  %v846_v52 = vld [vmem:[%s1301_s0 + $0xa0] sm:$0xff] }
  0x15   :  { %1345 = vst [vmem:[#allocation26_spill] sm:$0xff] %v770_v26  ;;  %v100_v36 = vadd.f32 %v99_v31, %v98_v24  ;;  %1347 = vst [vmem:[#allocation28_spill] sm:$0xff] %v778_v25  ;;  %v103_v31 = vsel %vm79_vm1, %v701_v14, 0.0  ;;  %v793_v24 = vsel %vm79_vm1, %v760_v12, 0.0  ;;  %v801_v25 = vsel %vm79_vm1, %v770_v26, 0.0  ;;  %v28_v9 = vld [vmem:[%s1301_s0 + $0x70] sm:$0xff] }
  0x16   :  { %1348 = vst [vmem:[#allocation29_spill] sm:$0xff] %v782_v4  ;;  %1350 = vst [vmem:[#allocation31_spill] sm:$0xff] %v793_v24  ;;  %v27_v4 = vld [vmem:[%s1301_s0 + $0x68] sm:$0xff]  ;;  %v862_v43 = vld [vmem:[%s1301_s0 + $0xb0] sm:$0xff] }
  0x17   :  { %1352 = vst [vmem:[#allocation33_spill] sm:$0xff] %v801_v25  ;;  %v102_v63 = vadd.f32 %v534_v32, %v100_v36  ;;  %1353 = vst [vmem:[#allocation34_spill] sm:$0xff] %v809_v58  ;;  %v105_v24 = vsel %vm79_vm1, %v27_v4, 0.0  ;;  %v818_v25 = vld [vmem:[%s1301_s0 + $0x78] sm:$0xff]  ;;  %v823_v32 = vld [vmem:[%s1301_s0 + $0x80] sm:$0xff]  ;;  %v107_v58 = vsel %vm79_vm1, %v28_v9, 0.0 }
  0x18   :  { %1354 = vst [vmem:[#allocation35_spill] sm:$0xff] %v818_v25  ;;  %1355 = vst [vmem:[#allocation36_spill] sm:$0xff] %v823_v32  ;;  %v828_v36 = vld [vmem:[%s1301_s0 + $0x88] sm:$0xff]  ;;  %v109_v50 = vsel %vm79_vm1, %v818_v25, 0.0  ;;  %v875_v39 = vld [vmem:[%s1301_s0 + $0xb8] sm:$0xff] }
  0x19   :  { %v104_v57 = vadd.f32 %v103_v31, %v102_v63  ;;  %1356 = vst [vmem:[#allocation37_spill] sm:$0xff] %v828_v36  ;;  %v217_v63 = vmul.f32 %v438_v1, %v438_v1  ;;  %v836_v31 = vld [vmem:[%s1301_s0 + $0x90] sm:$0xff]  ;;  %1358 = vst [vmem:[#allocation39_spill] sm:$0xff] %v841_v56  ;;  %v218_v1 = vmul.f32 %v443_v2, %v443_v2  ;;  %v857_v44 = vld [vmem:[%s1301_s0 + $0xa8] sm:$0xff] }
  0x1a   :  { %1357 = vst [vmem:[#allocation38_spill] sm:$0xff] %v836_v31  ;;  %1359 = vst [vmem:[#allocation40_spill] sm:$0xff] %v846_v52  ;;  %v115_v2 = vsel %vm79_vm1, %v836_v31, 0.0  ;;  %v880_v38 = vld [vmem:[%s1301_s0 + $0xc0] sm:$0xff]  ;;  %v885_v37 = vld [vmem:[%s1301_s0 + $0xc8] sm:$0xff]  ;;  %v119_v31 = vsel %vm79_vm1, %v846_v52, 0.0 }
  0x1b   :  { %v106_v51 = vadd.f32 %v105_v24, %v104_v57  ;;  %1360 = vst [vmem:[#allocation41_spill] sm:$0xff] %v857_v44  ;;  %1361 = vst [vmem:[#allocation42_spill] sm:$0xff] %v862_v43  ;;  %v111_v57 = vsel %vm79_vm1, %v823_v32, 0.0  ;;  %v113_v24 = vsel %vm79_vm1, %v828_v36, 0.0  ;;  %v121_v56 = vsel %vm79_vm1, %v857_v44, 0.0  ;;  %v896_v25 = vld [vmem:[%s1301_s0 + $0xd0] sm:$0xff] }
  0x1c   :  { %1362 = vst [vmem:[#allocation43_spill] sm:$0xff] %v875_v39  ;;  %1363 = vst [vmem:[#allocation44_spill] sm:$0xff] %v880_v38  ;;  %v220_v32 = vmul.f32 %v459_v7, %v459_v7  ;;  %v901_v0 = vld [vmem:[%s1301_s0 + $0xd8] sm:$0xff]  ;;  %v913_v7 = vsel %vm79_vm1, %v880_v38, 0.0  ;;  %v917_v44 = vsel %vm79_vm1, %v885_v37, 0.0  ;;  %v922_v52 = vld [vmem:[%s1301_s0 + $0xe0] sm:$0xff] }
  0x1d   :  { %1364 = vst [vmem:[#allocation45_spill] sm:$0xff] %v885_v37  ;;  %v108_v36 = vadd.f32 %v107_v58, %v106_v51  ;;  %1365 = vst [vmem:[#allocation46_spill] sm:$0xff] %v896_v25  ;;  %v905_v51 = vsel %vm79_vm1, %v862_v43, 0.0  ;;  %v909_v58 = vsel %vm79_vm1, %v875_v39, 0.0  ;;  %v927_v43 = vld [vmem:[%s1301_s0 + $0xe8] sm:$0xff]  ;;  %v932_v39 = vld [vmem:[%s1301_s0 + $0xf0] sm:$0xff] }
  0x1e   :  { %1366 = vst [vmem:[#allocation47_spill] sm:$0xff] %v901_v0  ;;  %1367 = vst [vmem:[#allocation48_spill] sm:$0xff] %v909_v58  ;;  %v936_v37 = vsel %vm79_vm1, %v896_v25, 0.0  ;;  %v946_v58 = vsel %vm79_vm1, %v922_v52, 0.0  ;;  %v950_v26 = vsel %vm79_vm1, %v927_v43, 0.0  ;;  %v223_v25 = vmul.f32 %v480_v16, %v480_v16 }
  0x1f   :  { %1368 = vst [vmem:[#allocation49_spill] sm:$0xff] %v913_v7  ;;  %1369 = vst [vmem:[#allocation50_spill] sm:$0xff] %v917_v44  ;;  %v110_v38 = vadd.f32 %v109_v50, %v108_v36  ;;  %v940_v44 = vsel %vm79_vm1, %v901_v0, 0.0  ;;  %v221_v7 = vmul.f32 %v466_v10, %v466_v10  ;;  %v954_v50 = vsel %vm79_vm1, %v932_v39, 0.0 }
  0x20   :  { %1370 = vst [vmem:[#allocation51_spill] sm:$0xff] %v922_v52  ;;  %1371 = vst [vmem:[#allocation52_spill] sm:$0xff] %v927_v43  ;;  %v222_v36 = vmul.f32 %v473_v13, %v473_v13  ;;  %v224_v10 = vmul.f32 %v485_v18, %v485_v18  ;;  %v225_v52 = vmul.f32 %v490_v19, %v490_v19 }
  0x21   :  { %1372 = vst [vmem:[#allocation53_spill] sm:$0xff] %v932_v39  ;;  %1373 = vst [vmem:[#allocation54_spill] sm:$0xff] %v954_v50  ;;  %v112_v0 = vadd.f32 %v111_v57, %v110_v38  ;;  %v226_v43 = vmul.f32 %v497_v21, %v497_v21  ;;  %v227_v39 = vmul.f32 %v502_v22, %v502_v22 }
  0x22   :  { %v228_v50 = vmul.f32 %v507_v23, %v507_v23  ;;  %v229_v13 = vmul.f32 %v701_v14, %v701_v14  ;;  %v972_v16 = vmul.f32 %v27_v4, %v27_v4  ;;  %v974_v57 = vmul.f32 %v28_v9, %v28_v9 }
  0x23   :  { %v114_v38 = vadd.f32 %v113_v24, %v112_v0  ;;  %v250_v18 = vmul.f32 %v516_v27, %v516_v27  ;;  %v251_v19 = vmul.f32 %v521_v28, %v521_v28  ;;  %v252_v21 = vmul.f32 %v526_v29, %v526_v29 }
  0x24   :  { %v253_v22 = vmul.f32 %v539_v33, %v539_v33  ;;  %v254_v23 = vmul.f32 %v544_v34, %v544_v34  ;;  %v255_v4 = vmul.f32 %v549_v35, %v549_v35  ;;  %v256_v9 = vmul.f32 %v566_v40, %v566_v40 }
  0x25   :  { %v116_v0 = vadd.f32 %v115_v2, %v114_v38  ;;  %v257_v27 = vmul.f32 %v571_v41, %v571_v41  ;;  %v258_v28 = vmul.f32 %v576_v42, %v576_v42  ;;  %v259_v29 = vmul.f32 %v593_v46, %v593_v46  ;;  %v1374_v38 = vld [vmem:[#allocation26_spill] sm:$0xff] }
  0x26   :  { %v260_v33 = vmul.f32 %v598_v47, %v598_v47  ;;  %v281_v34 = vsel %vm79_vm1, %v217_v63, 0.0  ;;  %v261_v35 = vmul.f32 %v603_v48, %v603_v48  ;;  %v282_v40 = vsel %vm79_vm1, %v218_v1, 0.0 }
  0x27   :  { %v118_v14 = vadd.f32 %v117_v3, %v116_v0  ;;  %v284_v24 = vsel %vm79_vm1, %v219_v45, 0.0  ;;  %v262_v41 = vmul.f32 %v620_v53, %v620_v53  ;;  %v263_v42 = vmul.f32 %v625_v54, %v625_v54 }
  0x28   :  { %v264_v46 = vmul.f32 %v630_v55, %v630_v55  ;;  %v283_v47 = vadd.f32 %v282_v40, %v281_v34  ;;  %v265_v63 = vmul.f32 %v647_v59, %v647_v59  ;;  %v266_v48 = vmul.f32 %v652_v60, %v652_v60  ;;  %v1375_v34 = vld [vmem:[#allocation48_spill] sm:$0xff] }
  0x29   :  { %v120_v2 = vadd.f32 %v119_v31, %v118_v14  ;;  %v286_v1 = vsel %vm79_vm1, %v220_v32, 0.0  ;;  %v267_v45 = vmul.f32 %v657_v61, %v657_v61  ;;  %v268_v53 = vmul.f32 %v674_v5, %v674_v5  ;;  %v1376_v14 = vld [vmem:[#allocation30_spill] sm:$0xff] }
  0x2a   :  { %v269_v54 = vmul.f32 %v679_v6, %v679_v6  ;;  %v285_v55 = vadd.f32 %v284_v24, %v283_v47  ;;  %v270_v31 = vmul.f32 %v684_v8, %v684_v8  ;;  %v271_v59 = vmul.f32 %v706_v15, %v706_v15  ;;  %v1377_v47 = vld [vmem:[#allocation49_spill] sm:$0xff] }
  0x2b   :  { %v122_v3 = vadd.f32 %v121_v56, %v120_v2  ;;  %v288_v60 = vsel %vm79_vm1, %v221_v7, 0.0  ;;  %v272_v32 = vmul.f32 %v711_v17, %v711_v17  ;;  %v273_v61 = vmul.f32 %v716_v20, %v716_v20 }
  0x2c   :  { %v274_v5 = vmul.f32 %v733_v49, %v733_v49  ;;  %v287_v6 = vadd.f32 %v286_v1, %v285_v55  ;;  %v275_v8 = vmul.f32 %v738_v30, %v738_v30  ;;  %v276_v15 = vmul.f32 %v743_v62, %v743_v62 }
  0x2d   :  { %v124_v56 = vadd.f32 %v905_v51, %v122_v3  ;;  %v290_v7 = vsel %vm79_vm1, %v222_v36, 0.0  ;;  %v277_v17 = vmul.f32 %v760_v12, %v760_v12  ;;  %v278_v20 = vmul.f32 %v765_v11, %v765_v11 }
  0x2e   :  { %v279_v49 = vmul.f32 %v1374_v38, %v1374_v38  ;;  %v289_v0 = vadd.f32 %v288_v60, %v287_v6  ;;  %v280_v30 = vmul.f32 %v1376_v14, %v1376_v14  ;;  %v292_v40 = vsel %vm79_vm1, %v223_v25, 0.0  ;;  %v1380_v14 = vld [vmem:[#allocation35_spill] sm:$0xff] }
  0x2f   :  { %v126_v51 = vadd.f32 %v1375_v34, %v124_v56  ;;  %v294_v62 = vsel %vm79_vm1, %v224_v10, 0.0  ;;  %v296_v24 = vsel %vm79_vm1, %v225_v52, 0.0  ;;  %v298_v12 = vsel %vm79_vm1, %v226_v43, 0.0  ;;  %v1162_v34 = vld [vmem:[%s1301_s0 + $0x100] sm:$0xff] }
  0x30   :  { %v291_v36 = vadd.f32 %v290_v7, %v289_v0  ;;  %v300_v11 = vsel %vm79_vm1, %v227_v39, 0.0  ;;  %v302_v1 = vsel %vm79_vm1, %v228_v50, 0.0  ;;  %v304_v55 = vsel %vm79_vm1, %v229_v13, 0.0  ;;  %v1378_v39 = vld [vmem:[#allocation50_spill] sm:$0xff] }
  0x31   :  { %v128_v2 = vadd.f32 %v1377_v47, %v126_v51  ;;  %v1055_v3 = vsel %vm79_vm1, %v250_v18, 0.0  ;;  %v1058_v25 = vsel %vm79_vm1, %v251_v19, 0.0  ;;  %v1061_v10 = vsel %vm79_vm1, %v252_v21, 0.0  ;;  %v1379_v51 = vld [vmem:[#allocation54_spill] sm:$0xff] }
  0x32   :  { %v293_v60 = vadd.f32 %v292_v40, %v291_v36  ;;  %v1064_v43 = vsel %vm79_vm1, %v253_v22, 0.0  ;;  %v1068_v6 = vsel %vm79_vm1, %v254_v23, 0.0  ;;  %v1071_v50 = vsel %vm79_vm1, %v255_v4, 0.0  ;;  %v1381_v36 = vld [vmem:[#allocation36_spill] sm:$0xff] }
  0x33   :  { %v130_v52 = vadd.f32 %v1378_v39, %v128_v2  ;;  %v1074_v13 = vsel %vm79_vm1, %v256_v9, 0.0  ;;  %v1077_v19 = vsel %vm79_vm1, %v257_v27, 0.0  ;;  %v1080_v21 = vsel %vm79_vm1, %v258_v28, 0.0  ;;  %v1382_v2 = vld [vmem:[#allocation37_spill] sm:$0xff] }
  0x34   :  { %v295_v18 = vadd.f32 %v294_v62, %v293_v60  ;;  %v1083_v22 = vsel %vm79_vm1, %v259_v29, 0.0  ;;  %v1087_v23 = vsel %vm79_vm1, %v260_v33, 0.0  ;;  %v1090_v4 = vsel %vm79_vm1, %v261_v35, 0.0 }
  0x35   :  { %v132_v56 = vadd.f32 %v936_v37, %v130_v52  ;;  %v1093_v9 = vsel %vm79_vm1, %v262_v41, 0.0  ;;  %v1096_v27 = vsel %vm79_vm1, %v263_v42, 0.0  ;;  %v1099_v28 = vsel %vm79_vm1, %v264_v46, 0.0 }
  0x36   :  { %v297_v7 = vadd.f32 %v296_v24, %v295_v18  ;;  %v1102_v29 = vsel %vm79_vm1, %v265_v63, 0.0  ;;  %v1106_v33 = vsel %vm79_vm1, %v266_v48, 0.0  ;;  %v1109_v35 = vsel %vm79_vm1, %v267_v45, 0.0  ;;  %v1384_v18 = vld [vmem:[#allocation38_spill] sm:$0xff] }
  0x37   :  { %v134_v37 = vadd.f32 %v940_v44, %v132_v56  ;;  %v1112_v41 = vsel %vm79_vm1, %v268_v53, 0.0  ;;  %v1115_v42 = vsel %vm79_vm1, %v269_v54, 0.0  ;;  %v1118_v46 = vsel %vm79_vm1, %v270_v31, 0.0 }
  0x38   :  { %v299_v38 = vadd.f32 %v298_v12, %v297_v7  ;;  %v1121_v63 = vsel %vm79_vm1, %v271_v59, 0.0  ;;  %v1125_v48 = vsel %vm79_vm1, %v272_v32, 0.0  ;;  %v1128_v45 = vsel %vm79_vm1, %v273_v61, 0.0 }
  0x39   :  { %v136_v44 = vadd.f32 %v946_v58, %v134_v37  ;;  %v1131_v53 = vsel %vm79_vm1, %v274_v5, 0.0  ;;  %v1134_v54 = vsel %vm79_vm1, %v275_v8, 0.0  ;;  %v1137_v31 = vsel %vm79_vm1, %v276_v15, 0.0  ;;  %v1145_v58 = vld [vmem:[%s1301_s0 + $0xf8] sm:$0xff]  ;;  %v1385_v37 = vld [vmem:[#allocation3_spill] sm:$0xff] }
  0x3a   :  { %v301_v0 = vadd.f32 %v300_v11, %v299_v38  ;;  %v1140_v59 = vsel %vm79_vm1, %v277_v17, 0.0  ;;  %v1149_v61 = vsel %vm79_vm1, %v278_v20, 0.0  ;;  %v1152_v5 = vsel %vm79_vm1, %v279_v49, 0.0 }
  0x3b   :  { %v138_v32 = vadd.f32 %v950_v26, %v136_v44  ;;  %v1155_v8 = vsel %vm79_vm1, %v280_v30, 0.0  ;;  %v141_v15 = vsel %vm79_vm1, %v1145_v58, 0.0  ;;  %v232_v20 = vmul.f32 %v1380_v14, %v1380_v14  ;;  %v1386_v44 = vld [vmem:[#allocation39_spill] sm:$0xff] }
  0x3c   :  { %v303_v17 = vadd.f32 %v302_v1, %v301_v0  ;;  %v306_v49 = vsel %vm79_vm1, %v972_v16, 0.0  ;;  %v143_v30 = vsel %vm79_vm1, %v1162_v34, 0.0  ;;  %v233_v24 = vmul.f32 %v1381_v36, %v1381_v36  ;;  %v1383_v16 = vld [vmem:[#allocation2_spill] sm:$0xff] }
  0x3d   :  { %v140_v26 = vadd.f32 %v1379_v51, %v138_v32  ;;  %v308_v12 = vsel %vm79_vm1, %v974_v57, 0.0  ;;  %v234_v1 = vmul.f32 %v1382_v2, %v1382_v2  ;;  %v310_v60 = vsel %vm79_vm1, %v232_v20, 0.0  ;;  %v1388_v51 = vld [vmem:[#allocation40_spill] sm:$0xff] }
  0x3e   :  { %v305_v40 = vadd.f32 %v304_v55, %v303_v17  ;;  %v235_v55 = vmul.f32 %v1384_v18, %v1384_v18  ;;  %v312_v56 = vsel %vm79_vm1, %v233_v24, 0.0  ;;  %v236_v57 = vmul.f32 %v1386_v44, %v1386_v44 }
  0x3f   :  { %v142_v62 = vadd.f32 %v141_v15, %v140_v26  ;;  %v314_v0 = vsel %vm79_vm1, %v234_v1, 0.0  ;;  %v1387_v15 = vld [vmem:[#allocation4_spill] sm:$0xff]  ;;  %v237_v26 = vmul.f32 %v1388_v51, %v1388_v51 }
  0x40   :  { %v307_v11 = vadd.f32 %v306_v49, %v305_v40  ;;  %v316_v14 = vsel %vm79_vm1, %v235_v55, 0.0  ;;  %v1389_v49 = vld [vmem:[#allocation5_spill] sm:$0xff]  ;;  %v318_v36 = vsel %vm79_vm1, %v236_v57, 0.0 }
  0x41   :  { %v144_v47 = vadd.f32 %v143_v30, %v142_v62  ;;  %v1390_v40 = vld [vmem:[#allocation41_spill] sm:$0xff]  ;;  %v320_v1 = vsel %vm79_vm1, %v237_v26, 0.0 }
  0x42   :  { %v309_v39 = vadd.f32 %v308_v12, %v307_v11  ;;  %v238_v62 = vmul.f32 %v1390_v40, %v1390_v40  ;;  %v1391_v12 = vld [vmem:[#allocation6_spill] sm:$0xff] }
  0x43   :  { %v146_v52 = vadd.f32 %v1383_v16, %v144_v47  ;;  %v1392_v47 = vld [vmem:[#allocation42_spill] sm:$0xff] }
  0x44   :  { %v311_v7 = vadd.f32 %v310_v60, %v309_v39  ;;  %v239_v2 = vmul.f32 %v1392_v47, %v1392_v47  ;;  %v1393_v39 = vld [vmem:[#allocation7_spill] sm:$0xff]  ;;  %v322_v55 = vsel %vm79_vm1, %v238_v62, 0.0 }
  0x45   :  { %v148_v38 = vadd.f32 %v1385_v37, %v146_v52  ;;  %v1394_v52 = vld [vmem:[#allocation43_spill] sm:$0xff] }
  0x46   :  { %v313_v32 = vadd.f32 %v312_v56, %v311_v7  ;;  %v240_v18 = vmul.f32 %v1394_v52, %v1394_v52  ;;  %v1395_v7 = vld [vmem:[#allocation8_spill] sm:$0xff]  ;;  %v324_v57 = vsel %vm79_vm1, %v239_v2, 0.0 }
  0x47   :  { %v150_v17 = vadd.f32 %v1387_v15, %v148_v38  ;;  %v1396_v38 = vld [vmem:[#allocation44_spill] sm:$0xff] }
  0x48   :  { %v315_v20 = vadd.f32 %v314_v0, %v313_v32  ;;  %v241_v44 = vmul.f32 %v1396_v38, %v1396_v38  ;;  %v1397_v32 = vld [vmem:[#allocation9_spill] sm:$0xff]  ;;  %v326_v26 = vsel %vm79_vm1, %v240_v18, 0.0 }
  0x49   :  { %v152_v30 = vadd.f32 %v1389_v49, %v150_v17  ;;  %v1398_v17 = vld [vmem:[#allocation45_spill] sm:$0xff] }
  0x4a   :  { %v317_v24 = vadd.f32 %v316_v14, %v315_v20  ;;  %v242_v51 = vmul.f32 %v1398_v17, %v1398_v17  ;;  %v1399_v20 = vld [vmem:[#allocation10_spill] sm:$0xff]  ;;  %v328_v62 = vsel %vm79_vm1, %v241_v44, 0.0 }
  0x4b   :  { %v154_v11 = vadd.f32 %v1391_v12, %v152_v30  ;;  %v1400_v30 = vld [vmem:[#allocation46_spill] sm:$0xff] }
  0x4c   :  { %v319_v60 = vadd.f32 %v318_v36, %v317_v24  ;;  %v243_v40 = vmul.f32 %v1400_v30, %v1400_v30  ;;  %v1401_v24 = vld [vmem:[#allocation11_spill] sm:$0xff]  ;;  %v330_v2 = vsel %vm79_vm1, %v242_v51, 0.0 }
  0x4d   :  { %v156_v16 = vadd.f32 %v1393_v39, %v154_v11  ;;  %v1402_v11 = vld [vmem:[#allocation47_spill] sm:$0xff] }
  0x4e   :  { %v321_v56 = vadd.f32 %v320_v1, %v319_v60  ;;  %v244_v47 = vmul.f32 %v1402_v11, %v1402_v11  ;;  %v1403_v60 = vld [vmem:[#allocation12_spill] sm:$0xff]  ;;  %v332_v18 = vsel %vm79_vm1, %v243_v40, 0.0 }
  0x4f   :  { %v158_v37 = vadd.f32 %v1395_v7, %v156_v16  ;;  %v1404_v16 = vld [vmem:[#allocation51_spill] sm:$0xff] }
  0x50   :  { %v323_v0 = vadd.f32 %v322_v55, %v321_v56  ;;  %v245_v52 = vmul.f32 %v1404_v16, %v1404_v16  ;;  %v1405_v56 = vld [vmem:[#allocation13_spill] sm:$0xff]  ;;  %v334_v44 = vsel %vm79_vm1, %v244_v47, 0.0 }
  0x51   :  { %v160_v15 = vadd.f32 %v1397_v32, %v158_v37  ;;  %v1406_v37 = vld [vmem:[#allocation52_spill] sm:$0xff]  ;;  %v1411_v47 = vld [vmem:[#allocation17_spill] sm:$0xff] }
  0x52   :  { %v325_v14 = vadd.f32 %v324_v57, %v323_v0  ;;  %v246_v38 = vmul.f32 %v1406_v37, %v1406_v37  ;;  %v1407_v0 = vld [vmem:[#allocation14_spill] sm:$0xff]  ;;  %v336_v51 = vsel %vm79_vm1, %v245_v52, 0.0 }
  0x53   :  { %v162_v49 = vadd.f32 %v1399_v20, %v160_v15  ;;  %v1408_v15 = vld [vmem:[#allocation53_spill] sm:$0xff] }
  0x54   :  { %v327_v36 = vadd.f32 %v326_v26, %v325_v14  ;;  %v247_v17 = vmul.f32 %v1408_v15, %v1408_v15  ;;  %v1409_v14 = vld [vmem:[#allocation15_spill] sm:$0xff]  ;;  %v338_v30 = vsel %vm79_vm1, %v246_v38, 0.0  ;;  %v1415_v38 = vld [vmem:[#allocation21_spill] sm:$0xff] }
  0x55   :  { %v164_v12 = vadd.f32 %v1401_v24, %v162_v49  ;;  %v248_v49 = vmul.f32 %v1145_v58, %v1145_v58  ;;  %v249_v24 = vmul.f32 %v1162_v34, %v1162_v34 }
  0x56   :  { %v329_v1 = vadd.f32 %v328_v62, %v327_v36  ;;  %v1410_v62 = vld [vmem:[#allocation16_spill] sm:$0xff] }
  0x57   :  { %v166_v39 = vadd.f32 %v1403_v60, %v164_v12  ;;  %v340_v12 = vsel %vm79_vm1, %v247_v17, 0.0  ;;  %v344_v58 = vsel %vm79_vm1, %v249_v24, 0.0  ;;  %v1417_v17 = vld [vmem:[#allocation23_spill] sm:$0xff]  ;;  %v1421_v24 = vld [vmem:[#allocation28_spill] sm:$0xff] }
  0x58   :  { %v331_v55 = vadd.f32 %v330_v2, %v329_v1  ;;  %v342_v1 = vsel %vm79_vm1, %v248_v49, 0.0 }
  0x59   :  { %v168_v7 = vadd.f32 %v1405_v56, %v166_v39  ;;  %v1412_v39 = vld [vmem:[#allocation18_spill] sm:$0xff] }
  0x5a   :  { %v333_v57 = vadd.f32 %v332_v18, %v331_v55  ;;  %v1413_v18 = vld [vmem:[#allocation19_spill] sm:$0xff] }
  0x5b   :  { %v170_v32 = vadd.f32 %v1407_v0, %v168_v7  ;;  %v1414_v7 = vld [vmem:[#allocation20_spill] sm:$0xff]  ;;  %v1416_v0 = vld [vmem:[#allocation22_spill] sm:$0xff] }
  0x5c   :  { %v335_v26 = vadd.f32 %v334_v44, %v333_v57 }
  0x5d   :  { %v172_v20 = vadd.f32 %v1409_v14, %v170_v32  ;;  %v1418_v14 = vld [vmem:[#allocation24_spill] sm:$0xff] }
  0x5e   :  { %v337_v40 = vadd.f32 %v336_v51, %v335_v26 }
  0x5f   :  { %v174_v36 = vadd.f32 %v1410_v62, %v172_v20  ;;  %v1420_v62 = vld [vmem:[#allocation27_spill] sm:$0xff] }
  0x60   :  { %v339_v11 = vadd.f32 %v338_v30, %v337_v40  ;;  %v1419_v30 = vld [vmem:[#allocation25_spill] sm:$0xff] }
  0x61   :  { %v176_v2 = vadd.f32 %v1411_v47, %v174_v36 }
  0x62   :  { %v341_v60 = vadd.f32 %v340_v12, %v339_v11  ;;  %v1422_v11 = vld [vmem:[#allocation29_spill] sm:$0xff] }
  0x63   :  { %v178_v16 = vadd.f32 %v1412_v39, %v176_v2  ;;  %v1423_v2 = vld [vmem:[#allocation31_spill] sm:$0xff] }
  0x64   :  { %v343_v52 = vadd.f32 %v342_v1, %v341_v60  ;;  %v1424_v60 = vld [vmem:[#allocation32_spill] sm:$0xff] }
  0x65   :  { %v180_v55 = vadd.f32 %v1413_v18, %v178_v16  ;;  %v1425_v16 = vld [vmem:[#allocation33_spill] sm:$0xff] }
  0x66   :  { %v345_v56 = vadd.f32 %v344_v58, %v343_v52  ;;  %v1426_v52 = vld [vmem:[#allocation34_spill] sm:$0xff] }
  0x67   :  { %v182_v37 = vadd.f32 %v1414_v7, %v180_v55 }
  0x68   :  { %v347_v34 = vadd.f32 %v1055_v3, %v345_v56 }
  0x69   :  { %v184_v44 = vadd.f32 %v1415_v38, %v182_v37 }
  0x6a   :  { %v349_v57 = vadd.f32 %v1058_v25, %v347_v34 }
  0x6b   :  { %v186_v32 = vadd.f32 %v1416_v0, %v184_v44 }
  0x6c   :  { %v351_v15 = vadd.f32 %v1061_v10, %v349_v57 }
  0x6d   :  { %v188_v51 = vadd.f32 %v1417_v17, %v186_v32 }
  0x6e   :  { %v353_v26 = vadd.f32 %v1064_v43, %v351_v15 }
  0x6f   :  { %v190_v20 = vadd.f32 %v1418_v14, %v188_v51 }
  0x70   :  { %v355_v49 = vadd.f32 %v1068_v6, %v353_v26 }
  0x71   :  { %v192_v40 = vadd.f32 %v1419_v30, %v190_v20 }
  0x72   :  { %v357_v3 = vadd.f32 %v1071_v50, %v355_v49 }
  0x73   :  { %v194_v36 = vadd.f32 %v1420_v62, %v192_v40 }
  0x74   :  { %v359_v25 = vadd.f32 %v1074_v13, %v357_v3 }
  0x75   :  { %v196_v12 = vadd.f32 %v1421_v24, %v194_v36 }
  0x76   :  { %v361_v10 = vadd.f32 %v1077_v19, %v359_v25 }
  0x77   :  { %v198_v47 = vadd.f32 %v1422_v11, %v196_v12 }
  0x78   :  { %v363_v43 = vadd.f32 %v1080_v21, %v361_v10 }
  0x79   :  { %v200_v1 = vadd.f32 %v1423_v2, %v198_v47 }
  0x7a   :  { %v365_v6 = vadd.f32 %v1083_v22, %v363_v43 }
  0x7b   :  { %v202_v39 = vadd.f32 %v1424_v60, %v200_v1 }
  0x7c   :  { %v367_v50 = vadd.f32 %v1087_v23, %v365_v6 }
  0x7d   :  { %v204_v58 = vadd.f32 %v1425_v16, %v202_v39 }
  0x7e   :  { %v369_v13 = vadd.f32 %v1090_v4, %v367_v50  ;;  %v78_v4 = vld [vmem:[%s1302_s1] sm:$0x1] }
  0x7f   :  { %v206_v18 = vadd.f32 %v1426_v52, %v204_v58 }
  0x80   :  { %v371_v19 = vadd.f32 %v1093_v9, %v369_v13 }
  0x81   :  { %v207_v55 = vrot.slane %v206_v18, 4 }
  0x82   :  { %v373_v56 = vadd.f32 %v1096_v27, %v371_v19 }
  0x83   :  { %v208_v21 = vadd.f32 %v207_v55, %v206_v18 }
  0x84   :  { %v375_v7 = vadd.f32 %v1099_v28, %v373_v56 }
  0x85   :  { %v209_v37 = vrot.slane %v208_v21, 2 }
  0x86   :  { %v377_v22 = vadd.f32 %v1102_v29, %v375_v7 }
  0x87   :  { %v210_v34 = vadd.f32 %v209_v37, %v208_v21 }
  0x88   :  { %v379_v23 = vadd.f32 %v1106_v33, %v377_v22 }
  0x89   :  { %v211_v38 = vrot.slane %v210_v34, 1 }
  0x8a   :  { %v381_v44 = vadd.f32 %v1109_v35, %v379_v23 }
  0x8b   :  { %v212_v9 = vadd.f32 %v211_v38, %v210_v34 }
  0x8c   :  { %v383_v27 = vadd.f32 %v1112_v41, %v381_v44 }
  0x8d   :  { %v213_v57 = vadd.f32 %v212_v9, %v78_v4 }
  0x8e   :  { %v385_v28 = vadd.f32 %v1115_v42, %v383_v27 }
  0x8f   :  { %215 = vst.msk [vmem:[%s1302_s1] sm:$0x1] %vm214_vm2, %v213_v57 }
  0x90   :  { %v387_v29 = vadd.f32 %v1118_v46, %v385_v28 }
  0x92   :  { %v389_v33 = vadd.f32 %v1121_v63, %v387_v29 }
  0x94   :  { %v391_v0 = vadd.f32 %v1125_v48, %v389_v33 }
  0x96   :  { %v393_v35 = vadd.f32 %v1128_v45, %v391_v0  ;;  %v216_v45 = vld [vmem:[%s1302_s1 + $0x1] sm:$0x1] }
  0x98   :  { %v395_v32 = vadd.f32 %v1131_v53, %v393_v35 }
  0x9a   :  { %v397_v41 = vadd.f32 %v1134_v54, %v395_v32 }
  0x9c   :  { %v399_v15 = vadd.f32 %v1137_v31, %v397_v41 }
  0x9e   :  { %v401_v42 = vadd.f32 %v1140_v59, %v399_v15 }
  0xa0   :  { %v403_v17 = vadd.f32 %v1149_v61, %v401_v42 }
  0xa2   :  { %v405_v51 = vadd.f32 %v1152_v5, %v403_v17 }
  0xa4   :  { %v407_v46 = vadd.f32 %v1155_v8, %v405_v51 }
  0xa6   :  { %v408_v26 = vrot.slane %v407_v46, 4 }
  0xa8   :  { %v409_v63 = vadd.f32 %v408_v26, %v407_v46 }
  0xaa   :  { %v410_v14 = vrot.slane %v409_v63, 2 }
  0xac   :  { %v411_v48 = vadd.f32 %v410_v14, %v409_v63 }
  0xae   :  { %v412_v20 = vrot.slane %v411_v48, 1 }
  0xb0   :  { %v413_v53 = vadd.f32 %v412_v20, %v411_v48 }
  0xb2   :  { %v414_v54 = vadd.f32 %v413_v53, %v216_v45 }
  0xb4   :  { %415 = vst.msk [vmem:[%s1302_s1 + $0x1] sm:$0x1] %vm214_vm2, %v414_v54 }

// kernel: generator_forward.16
= control target key start
LH: loop header
LB: loop body
LE: loop exit
PB: predicated region body
PF: predicated region fallthrough
CT: control target
= control target key end

     0   :  { %s853_s18 = smov 0   ;;  %s1073_s0 = inlined_call_operand.vmem [shape: f32[512,8], index: 0, kind: input, shape index: {}]   ;;  %s1074_s1 = inlined_call_operand.vmem [shape: f32[2,8], index: 1, kind: input, shape index: {}]   ;;  %s1075_s2 = inlined_call_operand.vmem [shape: f32[1,8], index: 2, kind: input, shape index: {}]   ;;  %s1076_s3 = inlined_call_operand.vmem [shape: f32[1,8], index: 3, kind: input, shape index: {}]   ;;  %s1077_s4 = inlined_call_operand.vmem [shape: bf16[8,48], index: 4, kind: input, shape index: {}]   ;;  %s1078_s5 = inlined_call_operand.vmem [shape: f32[512,48], index: 5, kind: output, shape index: {}]  }
   0x1 LB: > { %s721_s19 = sadd.s32 4294967295, %s820_s18   ;;  %p725_p0 = scmp.ge.s32.totalorder %s820_s18, 1  ;;  %s820_s18 = sphi %s853_s18, %s15_s18  }
   0x2   : > { %p188_p1 = scmp.lt.s32.totalorder %s820_s18, 3 }
   0x4   : > { %p189_p2 = pnand %p725_p0, %p188_p1 }
   0x5   : > { %v417_v0 = vld [vmem:[%s1077_s4] sm:$0xf] (!%p189_p2)  ;;  %vm467_vm0 = vcmask (!%p189_p2), 1043456   ;;  %v822_v9 = vmov (!%p189_p2), 1966171168   ;;  %v244_v11 = vlaneseq (!%p189_p2)  ;;  %s726_s24 = sshll.u32 (!%p189_p2), %s721_s19, 5 }
   0x6   : > { %192 = sbr.rel (%p189_p2) target bundleno = 291 (0x123), region = 40  ;;  %v229_v1 = vld [vmem:[%s1074_s1] sm:$0x3] (!%p189_p2)  ;;  %801 = vmatprep.subr.msk.bf16.mxu0 (!%p189_p2), %vm467_vm0, %v417_v0  ;;  %802 = vmatprep.subr.msk.bf16.mxu1 (!%p189_p2), %vm467_vm0, %v417_v0  ;;  %v469_v2 = vsel (!%p189_p2), %vm467_vm0, %v417_v0, 0  ;;  %v242_v10 = vunpack.c.l.s4 (!%p189_p2), %v822_v9  ;;  %p217_p3 = scmp.lt.s32.totalorder (!%p189_p2), %s726_s24, 63  ;;  %vm418_vm1 = vcmask (!%p189_p2), 64512  }
   0x7   : > { %v230_v3 = vmul.f32 (!%p189_p2), 0.001953125, %v229_v1  ;;  %766 = vmatpush3.bf16.msra.mxu0 (!%p189_p2), %v469_v2  ;;  %800 = vmatpush3.bf16.msra.mxu1 (!%p189_p2), %v469_v2  ;;  %v245_v13 = vshrl.u32 (!%p189_p2), %v244_v11, 7  ;;  %v237_v18 = vld [vmem:[%s1075_s2] sm:$0x1] (!%p189_p2)  ;;  %vm632_vm2 = vcmask (!%p189_p2), 392192  }
   0x8   : > { %v243_v12 = vunpack.c.0.s8 (!%p189_p2), %v242_v10  ;;  %v258_v22 = vld [vmem:[%s1076_s3] sm:$0x1] (!%p189_p2) }
   0x9   : > { %v231_v4 = vmul.f32 (!%p189_p2), %v230_v3, %v230_v3  ;;  %v296_v20 = vsub.s32 (!%p189_p2), 0, %v245_v13 }
   0xa   : > { %v246_v14 = vsub.s32 (!%p189_p2), %v243_v12, %v245_v13 }
   0xb   : > { %v233_v5 = vrot.slane (!%p189_p2), %v231_v4, 7 }
   0xd   : > { %v235_v6 = vsub.f32 %v230_v3, %v233_v5  ;;  %s1080_s24 = smov (!%p217_p3, %s726_s24), 63 }
   0xe   : > { %s727_s25 = sshll.u32 %s1080_s24, 3 }
   0xf   : > { %v236_v7 = vmax.f32 %v235_v6, 0.0  ;;  %s875_s28 = scalar_lea.vmem %s1073_s0, %s727_s25  ;;  %s1004_s10 = scalar_lea.vmem %s1078_s5, %s727_s25 }
  0x10   : > { %v261_v23 = vld [vmem:[%s875_s28] sm:$0xff]  ;;  %v262_v24 = vld [vmem:[%s875_s28 + $0x8] sm:$0xff]  ;;  %v263_v27 = vld [vmem:[%s875_s28 + $0x10] sm:$0xff] }
  0x11   : > { %v238_v8 = vadd.f32 1e-05, %v236_v7  ;;  %v277_v25 = vld [vmem:[%s875_s28 + $0x80] sm:$0xff]  ;;  %v278_v26 = vld [vmem:[%s875_s28 + $0x88] sm:$0xff]  ;;  %v264_v30 = vld [vmem:[%s875_s28 + $0x18] sm:$0xff] }
  0x12   : > { %v279_v31 = vld [vmem:[%s875_s28 + $0x90] sm:$0xff]  ;;  %v280_v32 = vld [vmem:[%s875_s28 + $0x98] sm:$0xff]  ;;  %v265_v33 = vld [vmem:[%s875_s28 + $0x20] sm:$0xff] }
  0x13   : > { %812 = vrsqrt.f32 %v238_v8  ;;  %v266_v34 = vld [vmem:[%s875_s28 + $0x28] sm:$0xff]  ;;  %v281_v35 = vld [vmem:[%s875_s28 + $0xa0] sm:$0xff]  ;;  %v267_v41 = vld [vmem:[%s875_s28 + $0x30] sm:$0xff] }
  0x14   : > { %v282_v40 = vld [vmem:[%s875_s28 + $0xa8] sm:$0xff]  ;;  %v268_v42 = vld [vmem:[%s875_s28 + $0x38] sm:$0xff]  ;;  %v283_v11 = vld [vmem:[%s875_s28 + $0xb0] sm:$0xff] }
  0x15   : > { %v284_v12 = vld [vmem:[%s875_s28 + $0xb8] sm:$0xff] }
  0x1d   : > { %v813_v15 = vpop.eup %812 }
  0x1e   : > { %v247_v16 = vrot.slane %v813_v15, %v246_v14 }
  0x20   : > { %v248_v17 = vcombine.high %v247_v16, %v247_v16 }
  0x22   : > { %v255_v19 = vrot.slane %v248_v17, %v246_v14  ;;  %v269_v17 = vld [vmem:[%s875_s28 + $0x40] sm:$0xff] }
  0x24   : > { %v257_v21 = vmul.f32 %v255_v19, %v237_v18 }
  0x26   : > { %v259_v28 = vmul.f32 %v257_v21, %v230_v3  ;;  %v888_v29 = vrot.slane %v257_v21, %v296_v20 }
  0x28   : > { %v260_v36 = vsub.f32 %v258_v22, %v259_v28  ;;  %v299_v37 = vmul.f32 %v888_v29, %v261_v23  ;;  %v300_v38 = vmul.f32 %v888_v29, %v262_v24  ;;  %v315_v39 = vmul.f32 %v888_v29, %v277_v25  ;;  %v270_v22 = vld [vmem:[%s875_s28 + $0x48] sm:$0xff] }
  0x29   : > { %v316_v43 = vmul.f32 %v888_v29, %v278_v26  ;;  %v301_v44 = vmul.f32 %v888_v29, %v263_v27  ;;  %v302_v45 = vmul.f32 %v888_v29, %v264_v30  ;;  %v317_v46 = vmul.f32 %v888_v29, %v279_v31  ;;  %v285_v27 = vld [vmem:[%s875_s28 + $0xc0] sm:$0xff]  ;;  %v286_v28 = vld [vmem:[%s875_s28 + $0xc8] sm:$0xff] }
  0x2a   : > { %v906_v47 = vrot.slane %v260_v36, %v296_v20  ;;  %v318_v48 = vmul.f32 %v888_v29, %v280_v32  ;;  %v303_v49 = vmul.f32 %v888_v29, %v265_v33  ;;  %v304_v50 = vmul.f32 %v888_v29, %v266_v34  ;;  %v271_v34 = vld [vmem:[%s875_s28 + $0x50] sm:$0xff] }
  0x2b   : > { %v319_v51 = vmul.f32 %v888_v29, %v281_v35  ;;  %v320_v52 = vmul.f32 %v888_v29, %v282_v40  ;;  %v305_v53 = vmul.f32 %v888_v29, %v267_v41  ;;  %v306_v54 = vmul.f32 %v888_v29, %v268_v42 }
  0x2c   : > { %v337_v55 = vadd.f32 %v906_v47, %v299_v37  ;;  %v338_v56 = vadd.f32 %v906_v47, %v300_v38  ;;  %v353_v57 = vadd.f32 %v906_v47, %v315_v39  ;;  %v354_v58 = vadd.f32 %v906_v47, %v316_v43  ;;  %v272_v39 = vld [vmem:[%s875_s28 + $0x58] sm:$0xff] }
  0x2d   : > { %v339_v59 = vadd.f32 %v906_v47, %v301_v44  ;;  %v340_v60 = vadd.f32 %v906_v47, %v302_v45  ;;  %v355_v61 = vadd.f32 %v906_v47, %v317_v46  ;;  %v356_v62 = vadd.f32 %v906_v47, %v318_v48  ;;  %v287_v44 = vld [vmem:[%s875_s28 + $0xd0] sm:$0xff] }
  0x2e   : > { %v369_v63 = vmax.f32 %v337_v55, 0.0  ;;  %v370_v0 = vmax.f32 %v338_v56, 0.0  ;;  %v385_v1 = vmax.f32 %v353_v57, 0.0  ;;  %v386_v2 = vmax.f32 %v354_v58, 0.0  ;;  %v273_v55 = vld [vmem:[%s875_s28 + $0x60] sm:$0xff] }
  0x2f   : > { %v371_v3 = vmax.f32 %v339_v59, 0.0  ;;  %v372_v4 = vmax.f32 %v340_v60, 0.0  ;;  %v387_v5 = vmax.f32 %v355_v61, 0.0  ;;  %v388_v6 = vmax.f32 %v356_v62, 0.0  ;;  %v274_v60 = vld [vmem:[%s875_s28 + $0x68] sm:$0xff] }
  0x30   : > { %v401_v7 = vpack.c.bf16 %v370_v0, %v369_v63  ;;  %v409_v8 = vpack.c.bf16 %v386_v2, %v385_v1  ;;  %v341_v9 = vadd.f32 %v906_v47, %v303_v49  ;;  %v342_v10 = vadd.f32 %v906_v47, %v304_v50  ;;  %v288_v50 = vld [vmem:[%s875_s28 + $0xd8] sm:$0xff]  ;;  %v289_v1 = vld [vmem:[%s875_s28 + $0xe0] sm:$0xff]  ;;  %v290_v2 = vld [vmem:[%s875_s28 + $0xe8] sm:$0xff] }
  0x31   : > { %v402_v13 = vpack.c.bf16 %v372_v4, %v371_v3  ;;  %v410_v14 = vpack.c.bf16 %v388_v6, %v387_v5  ;;  %v357_v15 = vadd.f32 %v906_v47, %v319_v51  ;;  %v358_v16 = vadd.f32 %v906_v47, %v320_v52 }
  0x32   : > { %767 = vmatprep.mubr.msk.bf16.mxu0 %vm418_vm1, %v401_v7  ;;  %783 = vmatprep.mubr.msk.bf16.mxu1 %vm418_vm1, %v409_v8  ;;  %v373_v18 = vmax.f32 %v341_v9, 0.0  ;;  %v374_v19 = vmax.f32 %v342_v10, 0.0  ;;  %v343_v20 = vadd.f32 %v906_v47, %v305_v53  ;;  %v344_v21 = vadd.f32 %v906_v47, %v306_v54  ;;  %v275_v7 = vld [vmem:[%s875_s28 + $0x70] sm:$0xff] }
  0x33   : > { %768 = vmatmul.mubr.msk.bf16.vlgmr.msra.gmra.mrb[0].mxu0 %vm418_vm1, %v402_v13  ;;  %784 = vmatmul.mubr.msk.bf16.vlgmr.msra.gmra.mrb[0].mxu1 %vm418_vm1, %v410_v14  ;;  %v389_v23 = vmax.f32 %v357_v15, 0.0  ;;  %v390_v24 = vmax.f32 %v358_v16, 0.0  ;;  %v321_v25 = vmul.f32 %v888_v29, %v283_v11  ;;  %v322_v26 = vmul.f32 %v888_v29, %v284_v12  ;;  %v276_v12 = vld [vmem:[%s875_s28 + $0x78] sm:$0xff] }
  0x34   : > { %v403_v30 = vpack.c.bf16 %v374_v19, %v373_v18  ;;  %v375_v31 = vmax.f32 %v343_v20, 0.0  ;;  %v376_v32 = vmax.f32 %v344_v21, 0.0  ;;  %v307_v33 = vmul.f32 %v888_v29, %v269_v17  ;;  %v291_v17 = vld [vmem:[%s875_s28 + $0xf0] sm:$0xff] }
  0x35   : > { %v411_v35 = vpack.c.bf16 %v390_v24, %v389_v23  ;;  %v359_v36 = vadd.f32 %v906_v47, %v321_v25  ;;  %v360_v37 = vadd.f32 %v906_v47, %v322_v26  ;;  %v308_v38 = vmul.f32 %v888_v29, %v270_v22  ;;  %v292_v22 = vld [vmem:[%s875_s28 + $0xf8] sm:$0xff] }
  0x36   : > { %771 = vmatprep.mubr.msk.bf16.mxu0 %vm418_vm1, %v403_v30  ;;  %v404_v40 = vpack.c.bf16 %v376_v32, %v375_v31  ;;  %v345_v41 = vadd.f32 %v906_v47, %v307_v33  ;;  %v323_v42 = vmul.f32 %v888_v29, %v285_v27  ;;  %v324_v43 = vmul.f32 %v888_v29, %v286_v28 }
  0x37   : > { %787 = vmatprep.mubr.msk.bf16.mxu1 %vm418_vm1, %v411_v35  ;;  %v391_v45 = vmax.f32 %v359_v36, 0.0  ;;  %v392_v46 = vmax.f32 %v360_v37, 0.0  ;;  %v346_v48 = vadd.f32 %v906_v47, %v308_v38  ;;  %v309_v49 = vmul.f32 %v888_v29, %v271_v34 }
  0x38   : > { %v377_v51 = vmax.f32 %v345_v41, 0.0  ;;  %v361_v52 = vadd.f32 %v906_v47, %v323_v42  ;;  %v362_v53 = vadd.f32 %v906_v47, %v324_v43  ;;  %v310_v54 = vmul.f32 %v888_v29, %v272_v39 }
  0x39   : > { %v412_v56 = vpack.c.bf16 %v392_v46, %v391_v45  ;;  %v378_v57 = vmax.f32 %v346_v48, 0.0  ;;  %v347_v58 = vadd.f32 %v906_v47, %v309_v49  ;;  %v325_v59 = vmul.f32 %v888_v29, %v287_v44 }
  0x3a   : > { %v393_v61 = vmax.f32 %v361_v52, 0.0  ;;  %v394_v62 = vmax.f32 %v362_v53, 0.0  ;;  %v348_v63 = vadd.f32 %v906_v47, %v310_v54  ;;  %v326_v0 = vmul.f32 %v888_v29, %v288_v50 }
  0x3b   : > { %772 = vmatmul.mubr.msk.bf16.gmra.mrb[4].mxu0 %vm418_vm1, %v404_v40  ;;  %788 = vmatmul.mubr.msk.bf16.gmra.mrb[4].mxu1 %vm418_vm1, %v412_v56  ;;  %v405_v3 = vpack.c.bf16 %v378_v57, %v377_v51  ;;  %v379_v4 = vmax.f32 %v347_v58, 0.0  ;;  %v363_v5 = vadd.f32 %v906_v47, %v325_v59  ;;  %v311_v6 = vmul.f32 %v888_v29, %v273_v55 }
  0x3c   : > { %v413_v8 = vpack.c.bf16 %v394_v62, %v393_v61  ;;  %v380_v9 = vmax.f32 %v348_v63, 0.0  ;;  %v364_v10 = vadd.f32 %v906_v47, %v326_v0  ;;  %v312_v11 = vmul.f32 %v888_v29, %v274_v60 }
  0x3d   : > { %775 = vmatprep.mubr.msk.bf16.mxu0 %vm418_vm1, %v405_v3  ;;  %v395_v13 = vmax.f32 %v363_v5, 0.0  ;;  %v349_v14 = vadd.f32 %v906_v47, %v311_v6  ;;  %v327_v15 = vmul.f32 %v888_v29, %v289_v1  ;;  %v328_v16 = vmul.f32 %v888_v29, %v290_v2 }
  0x3e   : > { %791 = vmatprep.mubr.msk.bf16.mxu1 %vm418_vm1, %v413_v8  ;;  %v406_v18 = vpack.c.bf16 %v380_v9, %v379_v4  ;;  %v396_v19 = vmax.f32 %v364_v10, 0.0  ;;  %v350_v20 = vadd.f32 %v906_v47, %v312_v11  ;;  %v313_v21 = vmul.f32 %v888_v29, %v275_v7 }
  0x3f   : > { %v381_v23 = vmax.f32 %v349_v14, 0.0  ;;  %v365_v24 = vadd.f32 %v906_v47, %v327_v15  ;;  %v366_v25 = vadd.f32 %v906_v47, %v328_v16  ;;  %v314_v26 = vmul.f32 %v888_v29, %v276_v12 }
  0x40   : > { %v414_v27 = vpack.c.bf16 %v396_v19, %v395_v13  ;;  %v382_v28 = vmax.f32 %v350_v20, 0.0  ;;  %v351_v30 = vadd.f32 %v906_v47, %v313_v21  ;;  %v329_v31 = vmul.f32 %v888_v29, %v291_v17 }
  0x41   : > { %v397_v32 = vmax.f32 %v365_v24, 0.0  ;;  %v398_v33 = vmax.f32 %v366_v25, 0.0  ;;  %v352_v34 = vadd.f32 %v906_v47, %v314_v26  ;;  %v330_v35 = vmul.f32 %v888_v29, %v292_v22 }
  0x42   : > { %v407_v36 = vpack.c.bf16 %v382_v28, %v381_v23  ;;  %v367_v37 = vadd.f32 %v906_v47, %v329_v31  ;;  %v383_v39 = vmax.f32 %v351_v30, 0.0 }
  0x43   : > { %776 = vmatmul.mubr.msk.bf16.gmra.mrb[8].mxu0 %vm418_vm1, %v406_v18  ;;  %792 = vmatmul.mubr.msk.bf16.gmra.mrb[8].mxu1 %vm418_vm1, %v414_v27  ;;  %v415_v38 = vpack.c.bf16 %v398_v33, %v397_v32  ;;  %v384_v40 = vmax.f32 %v352_v34, 0.0  ;;  %v368_v41 = vadd.f32 %v906_v47, %v330_v35 }
  0x44   : > { %779 = vmatprep.mubr.msk.bf16.mxu0 %vm418_vm1, %v407_v36  ;;  %v399_v42 = vmax.f32 %v367_v37, 0.0 }
  0x45   : > { %795 = vmatprep.mubr.msk.bf16.mxu1 %vm418_vm1, %v415_v38  ;;  %v400_v43 = vmax.f32 %v368_v41, 0.0  ;;  %v408_v29 = vpack.c.bf16 %v384_v40, %v383_v39 }
  0x47   : > { %v416_v44 = vpack.c.bf16 %v400_v43, %v399_v42 }
  0x4b   : > { %780 = vmatmul.mubr.msk.bf16.gmra.mrb[12].mxu0 %vm418_vm1, %v408_v29  ;;  %796 = vmatmul.mubr.msk.bf16.gmra.mrb[12].mxu1 %vm418_vm1, %v416_v44 }
 0x106   : > { %v769_v47 = vpop.f32.mrb[0].mxu0  ;;  %v785_v45 = vpop.f32.mrb[0].mxu1 }
 0x107   : > { %635 = vst.msk [vmem:[%s1004_s10 + $0x10] sm:$0xff] %vm632_vm2, %v769_v47  ;;  %651 = vst.msk [vmem:[%s1004_s10 + $0x90] sm:$0xff] %vm632_vm2, %v785_v45  ;;  %v505_v46 = vpop.f32.mrb[1].mxu0  ;;  %v569_v48 = vpop.f32.mrb[1].mxu1 }
 0x108   : > { %633 = vst.msk [vmem:[%s1004_s10] sm:$0xff] %vm632_vm2, %v505_v46  ;;  %649 = vst.msk [vmem:[%s1004_s10 + $0x80] sm:$0xff] %vm632_vm2, %v569_v48  ;;  %v770_v49 = vpop.f32.mrb[2].mxu0  ;;  %v786_v50 = vpop.f32.mrb[2].mxu1 }
 0x109   : > { %636 = vst.msk [vmem:[%s1004_s10 + $0x18] sm:$0xff] %vm632_vm2, %v770_v49  ;;  %652 = vst.msk [vmem:[%s1004_s10 + $0x98] sm:$0xff] %vm632_vm2, %v786_v50  ;;  %v508_v51 = vpop.f32.mrb[3].mxu0  ;;  %v572_v52 = vpop.f32.mrb[3].mxu1 }
 0x10a   : > { %634 = vst.msk [vmem:[%s1004_s10 + $0x8] sm:$0xff] %vm632_vm2, %v508_v51  ;;  %650 = vst.msk [vmem:[%s1004_s10 + $0x88] sm:$0xff] %vm632_vm2, %v572_v52 }
 0x10e   : > { %v773_v53 = vpop.f32.mrb[4].mxu0  ;;  %v789_v54 = vpop.f32.mrb[4].mxu1 }
 0x10f   : > { %639 = vst.msk [vmem:[%s1004_s10 + $0x30] sm:$0xff] %vm632_vm2, %v773_v53  ;;  %655 = vst.msk [vmem:[%s1004_s10 + $0xb0] sm:$0xff] %vm632_vm2, %v789_v54  ;;  %v521_v55 = vpop.f32.mrb[5].mxu0  ;;  %v585_v56 = vpop.f32.mrb[5].mxu1 }
 0x110   : > { %637 = vst.msk [vmem:[%s1004_s10 + $0x20] sm:$0xff] %vm632_vm2, %v521_v55  ;;  %653 = vst.msk [vmem:[%s1004_s10 + $0xa0] sm:$0xff] %vm632_vm2, %v585_v56  ;;  %v774_v57 = vpop.f32.mrb[6].mxu0  ;;  %v790_v58 = vpop.f32.mrb[6].mxu1 }
 0x111   : > { %640 = vst.msk [vmem:[%s1004_s10 + $0x38] sm:$0xff] %vm632_vm2, %v774_v57  ;;  %656 = vst.msk [vmem:[%s1004_s10 + $0xb8] sm:$0xff] %vm632_vm2, %v790_v58  ;;  %v524_v59 = vpop.f32.mrb[7].mxu0  ;;  %v588_v60 = vpop.f32.mrb[7].mxu1 }
 0x112   : > { %638 = vst.msk [vmem:[%s1004_s10 + $0x28] sm:$0xff] %vm632_vm2, %v524_v59  ;;  %654 = vst.msk [vmem:[%s1004_s10 + $0xa8] sm:$0xff] %vm632_vm2, %v588_v60 }
 0x116   : > { %v777_v61 = vpop.f32.mrb[8].mxu0  ;;  %v793_v62 = vpop.f32.mrb[8].mxu1 }
 0x117   : > { %643 = vst.msk [vmem:[%s1004_s10 + $0x50] sm:$0xff] %vm632_vm2, %v777_v61  ;;  %659 = vst.msk [vmem:[%s1004_s10 + $0xd0] sm:$0xff] %vm632_vm2, %v793_v62  ;;  %v537_v63 = vpop.f32.mrb[9].mxu0  ;;  %v601_v0 = vpop.f32.mrb[9].mxu1 }
 0x118   : > { %641 = vst.msk [vmem:[%s1004_s10 + $0x40] sm:$0xff] %vm632_vm2, %v537_v63  ;;  %657 = vst.msk [vmem:[%s1004_s10 + $0xc0] sm:$0xff] %vm632_vm2, %v601_v0  ;;  %v778_v1 = vpop.f32.mrb[10].mxu0  ;;  %v794_v2 = vpop.f32.mrb[10].mxu1 }
 0x119   : > { %644 = vst.msk [vmem:[%s1004_s10 + $0x58] sm:$0xff] %vm632_vm2, %v778_v1  ;;  %660 = vst.msk [vmem:[%s1004_s10 + $0xd8] sm:$0xff] %vm632_vm2, %v794_v2  ;;  %v540_v3 = vpop.f32.mrb[11].mxu0  ;;  %v604_v4 = vpop.f32.mrb[11].mxu1 }
 0x11a   : > { %642 = vst.msk [vmem:[%s1004_s10 + $0x48] sm:$0xff] %vm632_vm2, %v540_v3  ;;  %658 = vst.msk [vmem:[%s1004_s10 + $0xc8] sm:$0xff] %vm632_vm2, %v604_v4 }
 0x11e   : > { %v781_v5 = vpop.f32.mrb[12].mxu0  ;;  %v797_v6 = vpop.f32.mrb[12].mxu1 }
 0x11f   : > { %647 = vst.msk [vmem:[%s1004_s10 + $0x70] sm:$0xff] %vm632_vm2, %v781_v5  ;;  %663 = vst.msk [vmem:[%s1004_s10 + $0xf0] sm:$0xff] %vm632_vm2, %v797_v6  ;;  %v553_v7 = vpop.f32.mrb[13].mxu0  ;;  %v617_v8 = vpop.f32.mrb[13].mxu1 }
 0x120   : > { %645 = vst.msk [vmem:[%s1004_s10 + $0x60] sm:$0xff] %vm632_vm2, %v553_v7  ;;  %661 = vst.msk [vmem:[%s1004_s10 + $0xe0] sm:$0xff] %vm632_vm2, %v617_v8  ;;  %v782_v9 = vpop.f32.mrb[14].mxu0  ;;  %v798_v10 = vpop.f32.mrb[14].mxu1 }
 0x121   : > { %648 = vst.msk [vmem:[%s1004_s10 + $0x78] sm:$0xff] %vm632_vm2, %v782_v9  ;;  %664 = vst.msk [vmem:[%s1004_s10 + $0xf8] sm:$0xff] %vm632_vm2, %v798_v10  ;;  %v556_v11 = vpop.f32.mrb[15].mxu0  ;;  %v620_v12 = vpop.f32.mrb[15].mxu1 }
 0x122   : > { %646 = vst.msk [vmem:[%s1004_s10 + $0x68] sm:$0xff] %vm632_vm2, %v556_v11  ;;  %662 = vst.msk [vmem:[%s1004_s10 + $0xe8] sm:$0xff] %vm632_vm2, %v620_v12 }
 0x123 PF: > { %s15_s18 = sadd.s32 1, %s820_s18  }
 0x124   : > { %p12_p4 = scmp.ge.s32.totalorder %s15_s18, 4  }
 0x126   :  { %14 = sbr.rel (!%p12_p4) target bundleno = 1 (0x1), region = 70 }

// kernel: generator_forward.17
= control target key start
LH: loop header
LB: loop body
LE: loop exit
PB: predicated region body
PF: predicated region fallthrough
CT: control target
= control target key end

     0   :  { %s88_s0 = inlined_call_operand.vmem [shape: f32[48,128], index: 0, kind: input, shape index: {}]   ;;  %s89_s1 = inlined_call_operand.vmem [shape: f32[48,128], index: 1, kind: output, shape index: {}]  }
   0x1   :  { %v8_v0 = vld [vmem:[%s88_s0] sm:$0xff]  ;;  %v9_v1 = vld [vmem:[%s88_s0 + $0x8] sm:$0xff]  ;;  %v10_v2 = vld [vmem:[%s88_s0 + $0x10] sm:$0xff] }
   0x2   :  { %30 = vtanh.f32 %v8_v0  ;;  %v11_v3 = vld [vmem:[%s88_s0 + $0x18] sm:$0xff]  ;;  %v12_v4 = vld [vmem:[%s88_s0 + $0x20] sm:$0xff]  ;;  %v13_v5 = vld [vmem:[%s88_s0 + $0x28] sm:$0xff] }
   0x3   :  { %32 = vtanh.f32 %v9_v1 }
   0x4   :  { %34 = vtanh.f32 %v10_v2 }
   0x5   :  { %36 = vtanh.f32 %v11_v3 }
   0x6   :  { %38 = vtanh.f32 %v12_v4 }
   0x7   :  { %40 = vtanh.f32 %v13_v5 }
   0xc   :  { %v31_v6 = vpop.eup %30 }
   0xd   :  { %v33_v7 = vpop.eup %32  ;;  %20 = vst [vmem:[%s89_s1] sm:$0xff] %v31_v6 }
   0xe   :  { %v35_v8 = vpop.eup %34  ;;  %21 = vst [vmem:[%s89_s1 + $0x8] sm:$0xff] %v33_v7 }
   0xf   :  { %v37_v9 = vpop.eup %36  ;;  %22 = vst [vmem:[%s89_s1 + $0x10] sm:$0xff] %v35_v8 }
  0x10   :  { %v39_v10 = vpop.eup %38  ;;  %23 = vst [vmem:[%s89_s1 + $0x18] sm:$0xff] %v37_v9 }
  0x11   :  { %v41_v11 = vpop.eup %40  ;;  %24 = vst [vmem:[%s89_s1 + $0x20] sm:$0xff] %v39_v10 }
  0x12   :  { %25 = vst [vmem:[%s89_s1 + $0x28] sm:$0xff] %v41_v11 }

</bundles_post_ra>
